<compile_context>
chip_gen: v5e
topology: v5e:2x2
jax: 0.10.0
libtpu: 0.0.40
codegen_flags: <defaults>
</compile_context>

<pallas_src>
import jax
import jax.numpy as jnp
import numpy as np
from jax.experimental import pallas as pl
from jax.experimental.pallas import tpu as pltpu

# ----------------------------- problem sizes --------------------------------
H = W = 32
CIN = 1
C = 64
C3 = 3 * C                  # 192: three dx taps lane-concatenated
NOUT = 2

PH, PW = H + 2, W + 2       # 34, 34  zero-padded image
PITCH = 48                  # padded row pitch (multiple of 16 -> bf16 tile aligned)
SLAB_ROWS = PH * PITCH      # 1632 flat padded rows
NROW = H * PITCH            # 1536 accumulation rows (16 garbage cols / image row)
CHUNK = 4 * PITCH           # 192 rows per conv chunk (multiple of 16 and of PITCH)
NCHUNK = NROW // CHUNK      # 8
S1_ROWS = 96                # stage-1 row tile (multiple of 16, divides SLAB_ROWS)
S1_ITERS = SLAB_ROWS // S1_ROWS   # 17


# ------------------------------ fused kernel --------------------------------

def fused_model_kernel(xs_ref, wb_ref, w2_ref, b2_ref, wfc_ref, bfc_ref,
                       o_ref, xp_ref):
    # xs_ref:  (SLAB_ROWS, 8) bf16  cols = [x[r], m[r], x[r+1], m[r+1], x[r+2], m[r+2], 0, 0]
    # wb_ref:  (8, C3)       bf16   block-diagonal [w1; b1] per dx lane block
    # w2_ref:  (3, C3, C)    bf16   conv2 taps restacked per dy (row = dx*C + cin)
    # b2_ref:  (1, C)        f32
    # wfc_ref: (C, NOUT)     f32    fc weight with 1/(H*W) folded in
    # bfc_ref: (1, NOUT)     f32
    # o_ref:   (1, NOUT)     f32
    # xp_ref:  (SLAB_ROWS, C3) bf16 VMEM scratch: 3 dx-shifted ReLU activation blocks

    # ---- stage 1: 1x1 conv + bias + ReLU for all three dx-shifted blocks ----
    # One K=8 bf16 dot per row tile; the interior mask rides in the lhs so pad
    # positions come out exactly zero (x=0 there and mask kills b1).
    def s1_body(si, carry):
        r0 = pl.multiple_of(si * S1_ROWS, 16)
        pre = jnp.dot(xs_ref[pl.ds(r0, S1_ROWS), :], wb_ref[...],
                      preferred_element_type=jnp.float32)          # (S1_ROWS, C3)
        xp_ref[pl.ds(r0, S1_ROWS), :] = jnp.maximum(pre, 0.0).astype(jnp.bfloat16)
        return carry

    jax.lax.fori_loop(0, S1_ITERS, s1_body, 0)

    # ---- column-validity mask (valid output columns: row % PITCH < W) -------
    col = jax.lax.broadcasted_iota(jnp.int32, (1, CHUNK), 1)
    cmask = (col % PITCH < W).astype(jnp.float32)                  # (1, CHUNK)

    b2 = b2_ref[...]                                               # (1, C) f32

    # ---- stage 2: 3x3 conv (3 lane-concat dy taps) + LeakyReLU + sum pool ---
    def chunk_body(ci, pooled):
        base = ci * CHUNK
        acc = None
        for dy in range(3):                                        # static unroll
            start = pl.multiple_of(base + dy * PITCH, 16)
            part = jnp.dot(xp_ref[pl.ds(start, CHUNK), :], w2_ref[dy],
                           preferred_element_type=jnp.float32)     # (CHUNK, C)
            acc = part if acc is None else acc + part
        v5 = acc + b2
        v6 = jnp.where(v5 >= 0.0, v5, 0.1 * v5)                    # LeakyReLU(0.1)
        # Garbage columns are zeroed by the mask dot (MXU) before accumulation.
        return pooled + jnp.dot(cmask, v6, preferred_element_type=jnp.float32)

    pooled = jax.lax.fori_loop(0, NCHUNK, chunk_body,
                               jnp.zeros((1, C), jnp.float32))

    # ---- avg-pool scale already folded into wfc; final FC --------------------
    o_ref[...] = jnp.dot(pooled, wfc_ref[...],
                         preferred_element_type=jnp.float32) + bfc_ref[...]


# -------------------------------- wrapper ------------------------------------

def _interior_mask_ext():
    idx = np.arange(SLAB_ROWS)
    py, px = idx // PITCH, idx % PITCH
    m = ((py >= 1) & (py <= H) & (px >= 1) & (px <= W)).astype(np.float32)
    return jnp.asarray(np.concatenate([m, np.zeros(2, np.float32)]))


_MASK_EXT = _interior_mask_ext()        # (SLAB_ROWS + 2,) constant


@jax.jit
def model_forward(x_nchw, wb, w2cat, b2, wfc_s, bfc):
    # Tiny XLA-side prep on the 4 KiB input only: zero-pad to (34,34), extend
    # the row pitch to 48, flatten, and build the three dx-shifted (x, mask)
    # column pairs for the stage-1 block-diagonal matmul.
    xpad = jnp.pad(x_nchw[0, 0], ((1, 1), (1, 1)))                 # (34, 34)
    xrow = jnp.pad(xpad, ((0, 0), (0, PITCH - PW)))                # (34, 48)
    xe = jnp.pad(xrow.reshape(SLAB_ROWS), (0, 2))                  # (SLAB_ROWS + 2,)
    cols = []
    for dx in range(3):
        cols.append(xe[dx:dx + SLAB_ROWS])
        cols.append(_MASK_EXT[dx:dx + SLAB_ROWS])
    cols.append(jnp.zeros((SLAB_ROWS,), jnp.float32))
    cols.append(jnp.zeros((SLAB_ROWS,), jnp.float32))
    xs = jnp.stack(cols, axis=1).astype(jnp.bfloat16)              # (SLAB_ROWS, 8)

    out = pl.pallas_call(
        fused_model_kernel,
        out_shape=jax.ShapeDtypeStruct((1, NOUT), jnp.float32),
        in_specs=[pl.BlockSpec(memory_space=pltpu.MemorySpace.VMEM)] * 6,
        out_specs=pl.BlockSpec(memory_space=pltpu.MemorySpace.VMEM),
        scratch_shapes=[pltpu.VMEM((SLAB_ROWS, C3), jnp.bfloat16)],
    )(xs, wb, w2cat, b2, wfc_s, bfc)
    return out  # (1, 2)


# --------------------------- params / reference ------------------------------

def init_params(key):
    ks = jax.random.split(key, 6)
    conv1_w = jax.random.normal(ks[0], (C, CIN, 1, 1), jnp.float32) * 0.5
    conv1_b = jax.random.normal(ks[1], (C,), jnp.float32) * 0.1
    conv2_w = jax.random.normal(ks[2], (C, C, 3, 3), jnp.float32) * 0.05
    conv2_b = jax.random.normal(ks[3], (C,), jnp.float32) * 0.1
    fc_w = jax.random.normal(ks[4], (NOUT, C), jnp.float32) * 0.1
    fc_b = jax.random.normal(ks[5], (NOUT,), jnp.float32) * 0.1
    raw = (conv1_w, conv1_b, conv2_w, conv2_b, fc_w, fc_b)

    # Stage-1 block-diagonal weight (8, 192): rows 2*dx / 2*dx+1 hold w1 / b1
    # restricted to lane block dx, so one K=8 dot emits all three dx-shifted
    # activation blocks at once.
    w1v = conv1_w.reshape(C)
    wb = jnp.zeros((8, C3), jnp.float32)
    for dx in range(3):
        wb = wb.at[2 * dx, dx * C:(dx + 1) * C].set(w1v)
        wb = wb.at[2 * dx + 1, dx * C:(dx + 1) * C].set(conv1_b)
    wb = wb.astype(jnp.bfloat16)

    # conv2 weights restacked per dy: (3, 3*C, C), row index = dx*C + cin.
    w2cat = jnp.transpose(conv2_w, (2, 3, 1, 0)).reshape(3, C3, C).astype(jnp.bfloat16)

    b2 = conv2_b.reshape(1, C)
    wfc_s = fc_w.T * (1.0 / (H * W))          # fold avg-pool scale into FC weight
    bfc = fc_b.reshape(1, NOUT)
    return (wb, w2cat, b2, wfc_s, bfc), raw


def reference(x_nchw, raw):
    conv1_w, conv1_b, conv2_w, conv2_b, fc_w, fc_b = raw
    v1 = jax.lax.conv_general_dilated(
        x_nchw, conv1_w, (1, 1), 'VALID',
        dimension_numbers=('NCHW', 'OIHW', 'NCHW')) + conv1_b[None, :, None, None]
    v2 = jnp.maximum(v1, 0.0)
    v5 = jax.lax.conv_general_dilated(
        v2, conv2_w, (1, 1), 'SAME',
        dimension_numbers=('NCHW', 'OIHW', 'NCHW')) + conv2_b[None, :, None, None]
    v6 = jnp.where(v5 >= 0.0, v5, 0.1 * v5)
    v7 = jnp.mean(v6, axis=(2, 3))            # (1, 64)
    return v7 @ fc_w.T + fc_b[None, :]        # (1, 2)


# --------------------------------- main --------------------------------------

if __name__ == "__main__":
    key = jax.random.PRNGKey(0)
    kx, kp = jax.random.split(key)
    x1 = jax.random.normal(kx, (1, CIN, H, W), jnp.float32)   # matches torch.randn(1,1,32,32)

    params, raw = init_params(kp)
    out = model_forward(x1, *params)
    out = jax.block_until_ready(out)

    ref = reference(x1, raw)
    assert out.shape == (1, NOUT), out.shape
    # bf16 slab / conv2 weights -> tolerance loosened vs f32 reference.
    assert jnp.allclose(out, ref, rtol=2e-2, atol=2e-2), (out, ref)
    print("KERNEL_OK")
</pallas_src>

<mosaic_0001>
module attributes {stable_mosaic.version = 11 : i64} {
  func.func @fused_model_kernel(%arg0: memref<1632x8xbf16, #tpu.memory_space<vmem>>, %arg1: memref<8x192xbf16, #tpu.memory_space<vmem>>, %arg2: memref<3x192x64xbf16, #tpu.memory_space<vmem>>, %arg3: memref<1x64xf32, #tpu.memory_space<vmem>>, %arg4: memref<64x2xf32, #tpu.memory_space<vmem>>, %arg5: memref<1x2xf32, #tpu.memory_space<vmem>>, %arg6: memref<1x2xf32, #tpu.memory_space<vmem>>, %arg7: memref<1632x192xbf16, #tpu.memory_space<vmem>>) attributes {dimension_semantics = [], scalar_prefetch = 0 : i64, scratch_operands = 1 : i64, tpu.core_type = #tpu.core_type<tc>} {
    %c0_i32 = arith.constant 0 : i32
    %c17_i32 = arith.constant 17 : i32
    %0 = arith.addi %c0_i32, %c17_i32 : i32
    %c1_i32 = arith.constant 1 : i32
    scf.for %arg8 = %c0_i32 to %0 step %c1_i32  : i32 {
      %c96_i32 = arith.constant 96 : i32
      %31 = arith.muli %arg8, %c96_i32 : i32
      %32 = tpu.assume_multiple %31, 16 : i32
      %33 = arith.index_cast %32 : i32 to index
      %c0_17 = arith.constant 0 : index
      %34 = vector.load %arg0[%33, %c0_17] : memref<1632x8xbf16, #tpu.memory_space<vmem>>, vector<96x8xbf16>
      %c0_18 = arith.constant 0 : index
      %c0_19 = arith.constant 0 : index
      %35 = vector.load %arg1[%c0_18, %c0_19] : memref<8x192xbf16, #tpu.memory_space<vmem>>, vector<8x192xbf16>
      %cst_20 = arith.constant dense<0.000000e+00> : vector<96x192xf32>
      %36 = tpu.matmul %34, %35, %cst_20 {dimension_numbers = #tpu.dot_dimension_numbers<[1], [0], [0], [1], [0, 0, 1, 1], [], []>} : vector<96x8xbf16>, vector<8x192xbf16>, vector<96x192xf32> -> vector<96x192xf32>
      %cst_21 = arith.constant 0.000000e+00 : f32
      %37 = vector.broadcast %cst_21 : f32 to vector<96x192xf32>
      %38 = arith.maximumf %36, %37 : vector<96x192xf32>
      %39 = arith.truncf %38 : vector<96x192xf32> to vector<96x192xbf16>
      %40 = arith.index_cast %32 : i32 to index
      %c0_22 = arith.constant 0 : index
      %41 = vector.load %arg7[%40, %c0_22] : memref<1632x192xbf16, #tpu.memory_space<vmem>>, vector<96x192xbf16>
      tpu.vector_store %arg7[%40, %c0_22], %39 {strides = array<i32>} : memref<1632x192xbf16, #tpu.memory_space<vmem>>, vector<96x192xbf16>,
    }
    %c17_i32_0 = arith.constant 17 : i32
    %1 = tpu.iota {dimensions = array<i32: 1>} : vector<1x192xi32>
    %c48_i32 = arith.constant 48 : i32
    %c0_i32_1 = arith.constant 0 : i32
    %2 = arith.cmpi eq, %c48_i32, %c0_i32_1 : i32
    %c1_i32_2 = arith.constant 1 : i32
    %3 = arith.select %2, %c1_i32_2, %c48_i32 : i32
    %4 = vector.broadcast %3 : i32 to vector<1x192xi32>
    %5 = arith.remsi %1, %4 : vector<1x192xi32>
    %c0_i32_3 = arith.constant 0 : i32
    %6 = vector.broadcast %c0_i32_3 : i32 to vector<1x192xi32>
    %7 = arith.cmpi ne, %5, %6 : vector<1x192xi32>
    %c0_i32_4 = arith.constant 0 : i32
    %8 = vector.broadcast %c0_i32_4 : i32 to vector<1x192xi32>
    %9 = arith.cmpi slt, %5, %8 : vector<1x192xi32>
    %c0_i32_5 = arith.constant 0 : i32
    %10 = arith.cmpi slt, %3, %c0_i32_5 : i32
    %11 = vector.broadcast %10 : i1 to vector<1x192xi1>
    %12 = vector.broadcast %11 : vector<1x192xi1> to vector<1x192xi1>
    %13 = arith.xori %9, %12 : vector<1x192xi1>
    %14 = arith.andi %13, %7 : vector<1x192xi1>
    %15 = vector.broadcast %3 : i32 to vector<1x192xi32>
    %16 = arith.addi %5, %15 : vector<1x192xi32>
    %17 = arith.select %14, %16, %5 : vector<1x192xi1>, vector<1x192xi32>
    %c32_i32 = arith.constant 32 : i32
    %18 = vector.broadcast %c32_i32 : i32 to vector<1x192xi32>
    %19 = arith.cmpi slt, %17, %18 : vector<1x192xi32>
    %20 = arith.extui %19 : vector<1x192xi1> to vector<1x192xi32>
    %21 = arith.sitofp %20 : vector<1x192xi32> to vector<1x192xf32>
    %c0 = arith.constant 0 : index
    %c0_6 = arith.constant 0 : index
    %22 = vector.load %arg3[%c0, %c0_6] : memref<1x64xf32, #tpu.memory_space<vmem>>, vector<1x64xf32>
    %cst = arith.constant 0.000000e+00 : f32
    %23 = vector.broadcast %cst : f32 to vector<1x64xf32>
    %c0_i32_7 = arith.constant 0 : i32
    %c8_i32 = arith.constant 8 : i32
    %24 = arith.addi %c0_i32_7, %c8_i32 : i32
    %c1_i32_8 = arith.constant 1 : i32
    %25 = scf.for %arg8 = %c0_i32_7 to %24 step %c1_i32_8 iter_args(%arg9 = %23) -> (vector<1x64xf32>)  : i32 {
      %c192_i32 = arith.constant 192 : i32
      %31 = arith.muli %arg8, %c192_i32 : i32
      %c0_i32_17 = arith.constant 0 : i32
      %32 = arith.addi %31, %c0_i32_17 : i32
      %33 = tpu.assume_multiple %32, 16 : i32
      %34 = arith.index_cast %33 : i32 to index
      %c0_18 = arith.constant 0 : index
      %35 = vector.load %arg7[%34, %c0_18] : memref<1632x192xbf16, #tpu.memory_space<vmem>>, vector<192x192xbf16>
      %c0_19 = arith.constant 0 : index
      %c0_20 = arith.constant 0 : index
      %c0_21 = arith.constant 0 : index
      %36 = vector.load %arg2[%c0_19, %c0_20, %c0_21] : memref<3x192x64xbf16, #tpu.memory_space<vmem>>, vector<1x192x64xbf16>
      %37 = vector.shape_cast %36 : vector<1x192x64xbf16> to vector<192x64xbf16>
      %cst_22 = arith.constant dense<0.000000e+00> : vector<192x64xf32>
      %38 = tpu.matmul %35, %37, %cst_22 {dimension_numbers = #tpu.dot_dimension_numbers<[1], [0], [0], [1], [0, 0, 1, 1], [], []>} : vector<192x192xbf16>, vector<192x64xbf16>, vector<192x64xf32> -> vector<192x64xf32>
      %c48_i32_23 = arith.constant 48 : i32
      %39 = arith.addi %31, %c48_i32_23 : i32
      %40 = tpu.assume_multiple %39, 16 : i32
      %41 = arith.index_cast %40 : i32 to index
      %c0_24 = arith.constant 0 : index
      %42 = vector.load %arg7[%41, %c0_24] : memref<1632x192xbf16, #tpu.memory_space<vmem>>, vector<192x192xbf16>
      %c1 = arith.constant 1 : index
      %c0_25 = arith.constant 0 : index
      %c0_26 = arith.constant 0 : index
      %43 = vector.load %arg2[%c1, %c0_25, %c0_26] : memref<3x192x64xbf16, #tpu.memory_space<vmem>>, vector<1x192x64xbf16>
      %44 = vector.shape_cast %43 : vector<1x192x64xbf16> to vector<192x64xbf16>
      %cst_27 = arith.constant dense<0.000000e+00> : vector<192x64xf32>
      %45 = tpu.matmul %42, %44, %cst_27 {dimension_numbers = #tpu.dot_dimension_numbers<[1], [0], [0], [1], [0, 0, 1, 1], [], []>} : vector<192x192xbf16>, vector<192x64xbf16>, vector<192x64xf32> -> vector<192x64xf32>
      %46 = arith.addf %38, %45 : vector<192x64xf32>
      %c96_i32 = arith.constant 96 : i32
      %47 = arith.addi %31, %c96_i32 : i32
      %48 = tpu.assume_multiple %47, 16 : i32
      %49 = arith.index_cast %48 : i32 to index
      %c0_28 = arith.constant 0 : index
      %50 = vector.load %arg7[%49, %c0_28] : memref<1632x192xbf16, #tpu.memory_space<vmem>>, vector<192x192xbf16>
      %c2 = arith.constant 2 : index
      %c0_29 = arith.constant 0 : index
      %c0_30 = arith.constant 0 : index
      %51 = vector.load %arg2[%c2, %c0_29, %c0_30] : memref<3x192x64xbf16, #tpu.memory_space<vmem>>, vector<1x192x64xbf16>
      %52 = vector.shape_cast %51 : vector<1x192x64xbf16> to vector<192x64xbf16>
      %cst_31 = arith.constant dense<0.000000e+00> : vector<192x64xf32>
      %53 = tpu.matmul %50, %52, %cst_31 {dimension_numbers = #tpu.dot_dimension_numbers<[1], [0], [0], [1], [0, 0, 1, 1], [], []>} : vector<192x192xbf16>, vector<192x64xbf16>, vector<192x64xf32> -> vector<192x64xf32>
      %54 = arith.addf %46, %53 : vector<192x64xf32>
      %55 = vector.broadcast %22 : vector<1x64xf32> to vector<192x64xf32>
      %56 = arith.addf %54, %55 : vector<192x64xf32>
      %cst_32 = arith.constant 0.000000e+00 : f32
      %57 = vector.broadcast %cst_32 : f32 to vector<192x64xf32>
      %58 = arith.cmpf oge, %56, %57 : vector<192x64xf32>
      %cst_33 = arith.constant 1.000000e-01 : f32
      %59 = vector.broadcast %cst_33 : f32 to vector<192x64xf32>
      %60 = arith.mulf %59, %56 : vector<192x64xf32>
      %61 = arith.select %58, %56, %60 : vector<192x64xi1>, vector<192x64xf32>
      %cst_34 = arith.constant dense<0.000000e+00> : vector<1x64xf32>
      %62 = tpu.matmul %21, %61, %cst_34 {dimension_numbers = #tpu.dot_dimension_numbers<[1], [0], [0], [1], [0, 0, 1, 1], [], []>} : vector<1x192xf32>, vector<192x64xf32>, vector<1x64xf32> -> vector<1x64xf32>
      %63 = arith.addf %arg9, %62 : vector<1x64xf32>
      scf.yield %63 : vector<1x64xf32>
    }
    %c8_i32_9 = arith.constant 8 : i32
    %c0_10 = arith.constant 0 : index
    %c0_11 = arith.constant 0 : index
    %26 = vector.load %arg4[%c0_10, %c0_11] : memref<64x2xf32, #tpu.memory_space<vmem>>, vector<64x2xf32>
    %cst_12 = arith.constant dense<0.000000e+00> : vector<1x2xf32>
    %27 = tpu.matmul %25, %26, %cst_12 {dimension_numbers = #tpu.dot_dimension_numbers<[1], [0], [0], [1], [0, 0, 1, 1], [], []>} : vector<1x64xf32>, vector<64x2xf32>, vector<1x2xf32> -> vector<1x2xf32>
    %c0_13 = arith.constant 0 : index
    %c0_14 = arith.constant 0 : index
    %28 = vector.load %arg5[%c0_13, %c0_14] : memref<1x2xf32, #tpu.memory_space<vmem>>, vector<1x2xf32>
    %29 = arith.addf %27, %28 : vector<1x2xf32>
    %c0_15 = arith.constant 0 : index
    %c0_16 = arith.constant 0 : index
    %30 = vector.load %arg6[%c0_15, %c0_16] : memref<1x2xf32, #tpu.memory_space<vmem>>, vector<1x2xf32>
    tpu.vector_store %arg6[%c0_15, %c0_16], %29 {strides = array<i32>} : memref<1x2xf32, #tpu.memory_space<vmem>>, vector<1x2xf32>,
    return
  }
}

</mosaic_0001>

<bundles_post_ra>
// kernel: model_forward.1
= control target key start
LH: loop header
LB: loop body
LE: loop exit
PB: predicated region body
PF: predicated region fallthrough
CT: control target
= control target key end

     0   :  { %11 = vsyncpa [#allocation4], 0  ;;  %s2605_s21 = smov 0   ;;  %s3364_s0 = inlined_call_operand.vmem [shape: bf16[1632,8], index: 0, kind: input, shape index: {}]   ;;  %s3365_s1 = inlined_call_operand.vmem [shape: bf16[8,192], index: 1, kind: input, shape index: {}]   ;;  %s3366_s2 = inlined_call_operand.vmem [shape: bf16[3,192,64], index: 2, kind: input, shape index: {}]   ;;  %s3367_s3 = inlined_call_operand.vmem [shape: f32[1,64], index: 3, kind: input, shape index: {}]   ;;  %s3368_s4 = inlined_call_operand.vmem [shape: f32[64,2], index: 4, kind: input, shape index: {}]   ;;  %s3369_s5 = inlined_call_operand.vmem [shape: f32[1,2], index: 5, kind: input, shape index: {}]   ;;  %s3370_s6 = inlined_call_operand.hbm [shape: f32[1,2], index: 6, kind: output, shape index: {}]  }
   0x1 LB: > { %v48_v0 = vld [vmem:[%s3365_s1] sm:$0xff]  ;;  %vm103_vm0 = vcmask 1043456   ;;  %s31_s24 = smul.u32 96, %s2556_s21  ;;  %vm84_vm1 = vcmask 64512   ;;  %vm227_vm2 = vcmask 523268   ;;  %s30_s21 = sadd.s32 1, %s2556_s21   ;;  %s2556_s21 = sphi %s2605_s21, %s30_s21  }
   0x2   : > { %v80_v1 = vunpack.c.l.b16 %v48_v0  ;;  %v81_v2 = vunpack.c.h.b16 %v48_v0  ;;  %vm2636_vm3 = vmor %vm227_vm2, %vm103_vm0  ;;  %p27_p0 = scmp.ge.s32.totalorder %s30_s21, 17  }
   0x3   : > { %s2614_s25 = sshra.s32 %s31_s24, 3 }
   0x4   : > { %v82_v3 = vpack.c.b16 %v80_v1, %v80_v1  ;;  %v83_v4 = vpack.c.b16 %v81_v2, %v81_v2  ;;  %s1794_s26 = sshll.u32 %s2614_s25, 2  ;;  %s2366_s30 = sshll.u32 %s2614_s25, 3 }
   0x5   : > { %s35_s29 = scalar_lea.vmem %s3364_s0, %s1794_s26  ;;  %s2640_s7 = scalar_lea.vmem [#allocation2], %s2366_s30 }
   0x6   : > { %v105_v5 = vsel %vm103_vm0, %v82_v3, 0  ;;  %v108_v6 = vsel %vm103_vm0, %v83_v4, 0  ;;  %v2360_v7 = vld [vmem:[%s35_s29] sm:$0xff]  ;;  %v2363_v8 = vld [vmem:[%s35_s29 + $0x18] sm:$0xff]  ;;  %v2361_v9 = vld [vmem:[%s35_s29 + $0x8] sm:$0xff]  ;;  %s2694_s0 = smov (%p27_p0), 0  }
   0x7   : > { %117 = vmatpush.bf16.msra.mxu0 %v105_v5  ;;  %2478 = vmatpush.bf16.msra.mxu2 %v105_v5  ;;  %v2364_v10 = vld [vmem:[%s35_s29 + $0x20] sm:$0xff]  ;;  %v2362_v11 = vld [vmem:[%s35_s29 + $0x10] sm:$0xff]  ;;  %v2365_v12 = vld [vmem:[%s35_s29 + $0x28] sm:$0xff] }
   0x8   : > { %156 = vmatpush.bf16.msra.mxu1 %v108_v6  ;;  %2479 = vmatpush.bf16.msra.mxu3 %v108_v6 }
   0xa   : > { %1819 = vmatmul.msk.bf16.vlgmr.msra.gmra.mxu0 %vm84_vm1, %v2360_v7  ;;  %1822 = vmatmul.msk.bf16.vlgmr.msra.gmra.mxu2 %vm84_vm1, %v2363_v8 }
   0xb   : > { %1825 = vmatmul.msk.bf16.vlgmr.msra.gmra.mxu1 %vm84_vm1, %v2360_v7  ;;  %1828 = vmatmul.msk.bf16.vlgmr.msra.gmra.mxu3 %vm84_vm1, %v2363_v8 }
  0x1a   : > { %1820 = vmatmul.msk.bf16.gmra.mxu0 %vm84_vm1, %v2361_v9  ;;  %1823 = vmatmul.msk.bf16.gmra.mxu2 %vm84_vm1, %v2364_v10 }
  0x1b   : > { %1826 = vmatmul.msk.bf16.gmra.mxu1 %vm84_vm1, %v2361_v9  ;;  %1829 = vmatmul.msk.bf16.gmra.mxu3 %vm84_vm1, %v2364_v10  ;;  %v241_v10 = vlaneseq (%p27_p0) }
  0x2a   : > { %1821 = vmatmul.msk.bf16.gmra.mxu0 %vm84_vm1, %v2362_v11  ;;  %1824 = vmatmul.msk.bf16.gmra.mxu2 %vm84_vm1, %v2365_v12 }
  0x2b   : > { %1827 = vmatmul.msk.bf16.gmra.mxu1 %vm84_vm1, %v2362_v11  ;;  %1830 = vmatmul.msk.bf16.gmra.mxu3 %vm84_vm1, %v2365_v12  ;;  %v2684_v11 = vld [vmem:[%s3367_s3] sm:$0x1] (%p27_p0)  ;;  %v242_v12 = vand.u32 (%p27_p0), 127, %v241_v10 }
  0x87   : > { %v119_v13 = vpop.f32.mrf.mxu0 }
  0x88   : > { %v188_v14 = vmax.f32 %v119_v13, 0.0  ;;  %v158_v15 = vpop.f32.mrf.mxu1  ;;  %v243_v13 = vadd.s32 (%p27_p0), 128, %v242_v12 }
  0x89   : > { %v189_v16 = vmax.f32 %v158_v15, 0.0  ;;  %v248_v15 = vshrl.u32 (%p27_p0), %v242_v12, 16 }
  0x8b   : > { %v212_v18 = vpack.c.bf16 %v189_v16, %v188_v14  ;;  %v247_v14 = vand.u32 (%p27_p0), 65535, %v242_v12  ;;  %v252_v17 = vmul.u32 (%p27_p0), 43691, %v248_v15 }
  0x8d   : > { %229 = vst.msk [vmem:[%s2640_s7] sm:$0xff] %vm2636_vm3, %v212_v18  ;;  %v134_v19 = vpop.f32.mrf.mxu2  ;;  %v250_v16 = vmul.u32 (%p27_p0), 43691, %v247_v14  ;;  %v251_v18 = vmul.u32 (%p27_p0), 43690, %v247_v14 }
  0x8e   : > { %v200_v20 = vmax.f32 %v134_v19, 0.0  ;;  %v173_v21 = vpop.f32.mrf.mxu3  ;;  %v276_v19 = vand.u32 (%p27_p0), 65535, %v243_v13 }
  0x8f   : > { %v201_v22 = vmax.f32 %v173_v21, 0.0  ;;  %v121_v23 = vpop.f32.mrf.mxu0  ;;  %v253_v21 = vmul.u32 (%p27_p0), 43690, %v248_v15 }
  0x90   : > { %v190_v24 = vmax.f32 %v121_v23, 0.0  ;;  %v160_v25 = vpop.f32.mrf.mxu1  ;;  %v256_v23 = vshll.u32 (%p27_p0), %v252_v17, 16 }
  0x91   : > { %v218_v26 = vpack.c.bf16 %v201_v22, %v200_v20  ;;  %v191_v27 = vmax.f32 %v160_v25, 0.0  ;;  %v277_v20 = vshrl.u32 (%p27_p0), %v243_v13, 16  ;;  %v254_v22 = vshll.u32 (%p27_p0), %v251_v18, 16 }
  0x92   :  { %v280_v25 = vmul.u32 (%p27_p0), 43690, %v276_v19 }
  0x93   : > { %235 = vst.msk [vmem:[%s2640_s7 + $0x30] sm:$0xff] %vm2636_vm3, %v218_v26  ;;  %v213_v28 = vpack.c.bf16 %v191_v27, %v190_v24  ;;  %v279_v24 = vmul.u32 (%p27_p0), 43691, %v276_v19  ;;  %v281_v26 = vmul.u32 (%p27_p0), 43691, %v277_v20  ;;  %vm258_vm4 = vc.u32 (%p27_p0), %v250_v16, %v254_v22 }
  0x94   :  { %v260_v27 = vadd.s32 (%p27_p0), %v254_v22, %v250_v16 }
  0x95   : > { %230 = vst.msk [vmem:[%s2640_s7 + $0x8] sm:$0xff] %vm2636_vm3, %v213_v28  ;;  %v136_v29 = vpop.f32.mrf.mxu2  ;;  %v2566_v28 = vmov (%p27_p0), 0  }
  0x96   : > { %v202_v30 = vmax.f32 %v136_v29, 0.0  ;;  %v175_v31 = vpop.f32.mrf.mxu3  ;;  %v259_v29 = vsel (%p27_p0), %vm258_vm4, 1, %v2566_v28  ;;  %vm262_vm5 = vc.u32 (%p27_p0), %v260_v27, %v256_v23 }
  0x97   : > { %v203_v32 = vmax.f32 %v175_v31, 0.0  ;;  %v124_v33 = vpop.f32.mrf.mxu0  ;;  %v283_v31 = vshll.u32 (%p27_p0), %v280_v25, 16 }
  0x98   : > { %v192_v34 = vmax.f32 %v124_v33, 0.0  ;;  %v163_v35 = vpop.f32.mrf.mxu1  ;;  %v255_v33 = vshrl.u32 (%p27_p0), %v251_v18, 16 }
  0x99   : > { %v219_v36 = vpack.c.bf16 %v203_v32, %v202_v30  ;;  %v193_v37 = vmax.f32 %v163_v35, 0.0  ;;  %v282_v30 = vmul.u32 (%p27_p0), 43690, %v277_v20  ;;  %v285_v32 = vshll.u32 (%p27_p0), %v281_v26, 16 }
  0x9a   :  { %v263_v35 = vsel (%p27_p0), %vm262_vm5, 1, %v2566_v28  ;;  %vm287_vm6 = vc.u32 (%p27_p0), %v279_v24, %v283_v31 }
  0x9b   : > { %236 = vst.msk [vmem:[%s2640_s7 + $0x38] sm:$0xff] %vm2636_vm3, %v219_v36  ;;  %v214_v38 = vpack.c.bf16 %v193_v37, %v192_v34  ;;  %v261_v34 = vadd.s32 (%p27_p0), %v259_v29, %v253_v21  ;;  %v289_v36 = vadd.s32 (%p27_p0), %v283_v31, %v279_v24  ;;  %v257_v37 = vshrl.u32 (%p27_p0), %v252_v17, 16 }
  0x9d   : > { %231 = vst.msk [vmem:[%s2640_s7 + $0x10] sm:$0xff] %vm2636_vm3, %v214_v38  ;;  %v139_v39 = vpop.f32.mrf.mxu2  ;;  %v265_v38 = vadd.s32 (%p27_p0), %v263_v35, %v261_v34  ;;  %vm291_vm7 = vc.u32 (%p27_p0), %v289_v36, %v285_v32 }
  0x9e   : > { %v204_v40 = vmax.f32 %v139_v39, 0.0  ;;  %v178_v41 = vpop.f32.mrf.mxu3  ;;  %v288_v39 = vsel (%p27_p0), %vm287_vm6, 1, %v2566_v28 }
  0x9f   : > { %v205_v42 = vmax.f32 %v178_v41, 0.0  ;;  %v126_v43 = vpop.f32.mrf.mxu0  ;;  %v290_v41 = vadd.s32 (%p27_p0), %v288_v39, %v282_v30 }
  0xa0   : > { %v194_v44 = vmax.f32 %v126_v43, 0.0  ;;  %v165_v45 = vpop.f32.mrf.mxu1  ;;  %v292_v43 = vsel (%p27_p0), %vm291_vm7, 1, %v2566_v28 }
  0xa1   : > { %v220_v46 = vpack.c.bf16 %v205_v42, %v204_v40  ;;  %v195_v47 = vmax.f32 %v165_v45, 0.0  ;;  %v284_v40 = vshrl.u32 (%p27_p0), %v280_v25, 16  ;;  %v266_v42 = vadd.s32 (%p27_p0), %v265_v38, %v255_v33 }
  0xa2   :  { %v294_v45 = vadd.s32 (%p27_p0), %v292_v43, %v290_v41 }
  0xa3   : > { %237 = vst.msk [vmem:[%s2640_s7 + $0x40] sm:$0xff] %vm2636_vm3, %v220_v46  ;;  %v215_v48 = vpack.c.bf16 %v195_v47, %v194_v44  ;;  %v286_v44 = vshrl.u32 (%p27_p0), %v281_v26, 16  ;;  %v267_v46 = vadd.s32 (%p27_p0), %v266_v42, %v257_v37 }
  0xa4   :  { %v295_v47 = vadd.s32 (%p27_p0), %v294_v45, %v284_v40 }
  0xa5   : > { %232 = vst.msk [vmem:[%s2640_s7 + $0x18] sm:$0xff] %vm2636_vm3, %v215_v48  ;;  %v141_v49 = vpop.f32.mrf.mxu2  ;;  %v268_v48 = vshrl.u32 (%p27_p0), %v267_v46, 5 }
  0xa6   : > { %v206_v50 = vmax.f32 %v141_v49, 0.0  ;;  %v180_v51 = vpop.f32.mrf.mxu3  ;;  %v296_v49 = vadd.s32 (%p27_p0), %v295_v47, %v286_v44 }
  0xa7   : > { %v207_v52 = vmax.f32 %v180_v51, 0.0  ;;  %v129_v53 = vpop.f32.mrf.mxu0 }
  0xa8   : > { %v196_v54 = vmax.f32 %v129_v53, 0.0  ;;  %v168_v55 = vpop.f32.mrf.mxu1  ;;  %v297_v51 = vshrl.u32 (%p27_p0), %v296_v49, 5 }
  0xa9   : > { %v221_v56 = vpack.c.bf16 %v207_v52, %v206_v50  ;;  %v197_v57 = vmax.f32 %v168_v55, 0.0  ;;  %v269_v50 = vmul.u32 (%p27_p0), 48, %v268_v48 }
  0xaa   :  { %v298_v53 = vmul.u32 (%p27_p0), 48, %v297_v51 }
  0xab   : > { %238 = vst.msk [vmem:[%s2640_s7 + $0x48] sm:$0xff] %vm2636_vm3, %v221_v56  ;;  %v216_v58 = vpack.c.bf16 %v197_v57, %v196_v54  ;;  %v270_v52 = vsub.s32 (%p27_p0), %v242_v12, %v269_v50 }
  0xac   :  { %v299_v55 = vsub.s32 (%p27_p0), %v243_v13, %v298_v53 }
  0xad   : > { %233 = vst.msk [vmem:[%s2640_s7 + $0x20] sm:$0xff] %vm2636_vm3, %v216_v58  ;;  %v144_v59 = vpop.f32.mrf.mxu2  ;;  %vm302_vm8 = vcmp.ne.s32.totalorder (%p27_p0), %v270_v52, 0  ;;  %vm304_vm9 = vcmp.lt.s32.totalorder (%p27_p0), %v270_v52, 0  ;;  %v308_v54 = vadd.s32 (%p27_p0), 48, %v270_v52  ;;  %v3374_v58 = vmov (%p27_p0), 0 }
  0xae   : > { %v208_v60 = vmax.f32 %v144_v59, 0.0  ;;  %v183_v61 = vpop.f32.mrf.mxu3  ;;  %vm306_vm10 = vmand (%p27_p0), %vm304_vm9, %vm302_vm8  ;;  %vm303_vm11 = vcmp.ne.s32.totalorder (%p27_p0), %v299_v55, 0  ;;  %vm305_vm12 = vcmp.lt.s32.totalorder (%p27_p0), %v299_v55, 0  ;;  %v309_v57 = vadd.s32 (%p27_p0), 48, %v299_v55 }
  0xaf   : > { %v209_v62 = vmax.f32 %v183_v61, 0.0  ;;  %v131_v63 = vpop.f32.mrf.mxu0  ;;  %v310_v56 = vsel (%p27_p0), %vm306_vm10, %v308_v54, %v270_v52  ;;  %vm307_vm14 = vmand (%p27_p0), %vm305_vm12, %vm303_vm11 }
  0xb0   : > { %v198_v0 = vmax.f32 %v131_v63, 0.0  ;;  %v170_v1 = vpop.f32.mrf.mxu1  ;;  %vm2686_vm13 = vcmp.lt.s32.totalorder (%p27_p0), %v310_v56, 32  ;;  %v311_v59 = vsel (%p27_p0), %vm307_vm14, %v309_v57, %v299_v55 }
  0xb1   : > { %v222_v2 = vpack.c.bf16 %v209_v62, %v208_v60  ;;  %v199_v3 = vmax.f32 %v170_v1, 0.0  ;;  %v3375_v58 = vsel (%p27_p0), %vm2686_vm13, 4294967295, %v3374_v58  ;;  %vm313_vm15 = vcmp.lt.s32.totalorder (%p27_p0), %v311_v59, 32 }
  0xb2   :  { %3376 = vst [vmem:[#allocation6_spill] sm:$0xff] (%p27_p0), %v3375_v58  ;;  %v2567_v60 = vmov (%p27_p0), 0.0   ;;  %v2692_v62 = vmov (%p27_p0), 0.0  }
  0xb3   : > { %239 = vst.msk [vmem:[%s2640_s7 + $0x50] sm:$0xff] %vm2636_vm3, %v222_v2  ;;  %v217_v4 = vpack.c.bf16 %v199_v3, %v198_v0  ;;  %v2690_v61 = vsel (%p27_p0), %vm313_vm15, 1.0, %v2567_v60 }
  0xb4   :  { %3377 = vst [vmem:[#allocation7_spill] sm:$0xff] (%p27_p0), %v2690_v61 }
  0xb5   : > { %234 = vst.msk [vmem:[%s2640_s7 + $0x28] sm:$0xff] %vm2636_vm3, %v217_v4  ;;  %v146_v5 = vpop.f32.mrf.mxu2 }
  0xb6   : > { %v210_v6 = vmax.f32 %v146_v5, 0.0  ;;  %v185_v7 = vpop.f32.mrf.mxu3 }
  0xb7   : > { %v211_v8 = vmax.f32 %v185_v7, 0.0  ;;  %29 = sbr.rel (!%p27_p0) target bundleno = 1 (0x1), region = 65 }
  0xb9   : > { %v223_v9 = vpack.c.bf16 %v211_v8, %v210_v6 }
  0xbb   : > { %240 = vst.msk [vmem:[%s2640_s7 + $0x58] sm:$0xff] %vm2636_vm3, %v223_v9 }
  0xbc LB: > { %3378 = vst [vmem:[#allocation8_spill] sm:$0xff] %v2560_v62  ;;  %v2436_v63 = vld [vmem:[%s3366_s2 + $0x98] sm:$0xff]  ;;  %v2435_v3 = vld [vmem:[%s3366_s2 + $0x90] sm:$0xff]  ;;  %s2728_s20 = smul.u32 192, %s2564_s0  ;;  %v2434_v7 = vld [vmem:[%s3366_s2 + $0x88] sm:$0xff]  ;;  %vm615_vm0 = vcmask 523264   ;;  %s2564_s0 = sphi %s2694_s0, %s324_s0   ;;  %v2560_v62 = vphi %v2692_v62, %v3418_v62  }
  0xbd   : > { %v2708_v0 = vld [vmem:[%s3366_s2 + $0xb8] sm:$0xff]  ;;  %652 = vmatpush.bf16.msra.mxu0 %v2436_v63  ;;  %v2725_v4 = vld [vmem:[%s3366_s2 + $0xb0] sm:$0xff]  ;;  %v2748_v8 = vld [vmem:[%s3366_s2 + $0xa8] sm:$0xff]  ;;  %s324_s0 = sadd.s32 1, %s2564_s0  }
  0xbe   : > { %v2399_v1 = vld [vmem:[%s3366_s2 + $0x38] sm:$0xff]  ;;  %2480 = vmatpush.bf16.msra.mxu1 %v2708_v0  ;;  %v2398_v5 = vld [vmem:[%s3366_s2 + $0x30] sm:$0xff]  ;;  %s380_s25 = sadd.s32 48, %s2728_s20  ;;  %s327_s26 = sshra.s32 %s2728_s20, 3  ;;  %v2397_v9 = vld [vmem:[%s3366_s2 + $0x28] sm:$0xff] }
  0xbf   : > { %v2716_v2 = vld [vmem:[%s3366_s2 + $0x58] sm:$0xff]  ;;  %1006 = vmatpush.bf16.msra.mxu2 %v2399_v1  ;;  %v2737_v6 = vld [vmem:[%s3366_s2 + $0x50] sm:$0xff]  ;;  %s381_s27 = sshra.s32 %s380_s25, 3  ;;  %s2367_s28 = sshll.u32 %s327_s26, 3  ;;  %v2401_v10 = vld [vmem:[%s3366_s2 + $0x48] sm:$0xff] }
  0xc0   : > { %2484 = vmatpush.bf16.msra.mxu3 %v2716_v2  ;;  %s2404_s9 = sshll.u32 %s381_s27, 3  ;;  %v2433_v12 = vld [vmem:[%s3366_s2 + $0x80] sm:$0xff]  ;;  %s2776_s22 = scalar_lea.vmem [#allocation2], %s2367_s28  ;;  %v2432_v22 = vld [vmem:[%s3366_s2 + $0x78] sm:$0xff]  ;;  %v2431_v24 = vld [vmem:[%s3366_s2 + $0x70] sm:$0xff] }
  0xc1   : > { %653 = vmatpush.bf16.msra.mxu0 %v2435_v3  ;;  %v2763_v13 = vld [vmem:[%s3366_s2 + $0xa0] sm:$0xff]  ;;  %s2769_s18 = scalar_lea.vmem [#allocation2], %s2404_s9  ;;  %v2395_v23 = vld [vmem:[%s3366_s2 + $0x18] sm:$0xff]  ;;  %v2394_v25 = vld [vmem:[%s3366_s2 + $0x10] sm:$0xff]  ;;  %s1144_s14 = sadd.s32 96, %s2728_s20 }
  0xc2   : > { %2481 = vmatpush.bf16.msra.mxu1 %v2725_v4  ;;  %v2396_v14 = vld [vmem:[%s3366_s2 + $0x20] sm:$0xff]  ;;  %v2415_v15 = vld [vmem:[%s2769_s18 + $0x54] sm:$0xf]  ;;  %v1907_v16 = vld [vmem:[%s2769_s18 + $0x58] sm:$0xf0]  ;;  %s1145_s15 = sshra.s32 %s1144_s14, 3 }
  0xc3   : > { %1007 = vmatpush.bf16.msra.mxu2 %v2398_v5  ;;  %v2400_v18 = vld [vmem:[%s3366_s2 + $0x40] sm:$0xff]  ;;  %v2378_v17 = vld [vmem:[%s2776_s22 + $0x54] sm:$0xf]  ;;  %v2063_v19 = vld [vmem:[%s2776_s22 + $0x58] sm:$0xf0]  ;;  %v1910_v20 = vor.u32 %v2415_v15, %v1907_v16  ;;  %s2441_s16 = sshll.u32 %s1145_s15, 3 }
  0xc4   : > { %2485 = vmatpush.bf16.msra.mxu3 %v2737_v6  ;;  %v2066_v21 = vor.u32 %v2378_v17, %v2063_v19  ;;  %v2430_v26 = vld [vmem:[%s3366_s2 + $0x68] sm:$0xff]  ;;  %v2429_v28 = vld [vmem:[%s3366_s2 + $0x60] sm:$0xff]  ;;  %v1873_v42 = vld [vmem:[%s2769_s18 + $0x10] sm:$0xf]  ;;  %s2913_s17 = scalar_lea.vmem [#allocation2], %s2441_s16  ;;  %p321_p1 = scmp.ge.s32.totalorder %s324_s0, 8  }
  0xc5   : > { %654 = vmatpush.bf16.msra.mxu0 %v2434_v7  ;;  %v2393_v27 = vld [vmem:[%s3366_s2 + $0x8] sm:$0xff]  ;;  %v2392_v29 = vld [vmem:[%s3366_s2] sm:$0xff]  ;;  %v2408_v43 = vld [vmem:[%s2769_s18 + $0x14] sm:$0xf0]  ;;  %s2569_s1 = smov (%p321_p1), [#allocation3]   ;;  %s1762_s12 = sshll.u32 (%p321_p1), %s3370_s6, 4  ;;  %s1763_s12 = int_to_ptr.hbm [resolvable:$true] %s1762_s12 }
  0xc6   : > { %2482 = vmatpush.bf16.msra.mxu1 %v2748_v8  ;;  %v1865_v30 = vld [vmem:[%s2769_s18] sm:$0xf]  ;;  %v2406_v31 = vld [vmem:[%s2769_s18 + $0x4] sm:$0xf0]  ;;  %v2417_v32 = vld [vmem:[%s2769_s18 + $0x64] sm:$0xf]  ;;  %v1874_v50 = vor.u32 %v2408_v43, %v1873_v42 }
  0xc7   : > { %1008 = vmatpush.bf16.msra.mxu2 %v2397_v9  ;;  %v1915_v33 = vld [vmem:[%s2769_s18 + $0x68] sm:$0xf0]  ;;  %v2021_v34 = vld [vmem:[%s2776_s22] sm:$0xf]  ;;  %v2369_v35 = vld [vmem:[%s2776_s22 + $0x4] sm:$0xf0]  ;;  %v1866_v38 = vor.u32 %v2406_v31, %v1865_v30 }
  0xc8   : > { %2486 = vmatpush.bf16.msra.mxu3 %v2401_v10  ;;  %v2380_v36 = vld [vmem:[%s2776_s22 + $0x64] sm:$0xf]  ;;  %v2071_v37 = vld [vmem:[%s2776_s22 + $0x68] sm:$0xf0]  ;;  %v1918_v39 = vor.u32 %v2417_v32, %v1915_v33  ;;  %v2022_v40 = vor.u32 %v2369_v35, %v2021_v34  ;;  %v2419_v44 = vld [vmem:[%s2769_s18 + $0x74] sm:$0xf] }
  0xc9   : > { %655 = vmatpush.bf16.msra.mxu0 %v2433_v12  ;;  %v2074_v41 = vor.u32 %v2380_v36, %v2071_v37  ;;  %v1923_v45 = vld [vmem:[%s2769_s18 + $0x78] sm:$0xf0]  ;;  %v2029_v46 = vld [vmem:[%s2776_s22 + $0x10] sm:$0xf]  ;;  %v2371_v47 = vld [vmem:[%s2776_s22 + $0x14] sm:$0xf0] }
  0xca   : > { %2483 = vmatpush.bf16.msra.mxu1 %v2763_v13  ;;  %v2382_v48 = vld [vmem:[%s2776_s22 + $0x74] sm:$0xf]  ;;  %v2079_v49 = vld [vmem:[%s2776_s22 + $0x78] sm:$0xf0]  ;;  %v1926_v51 = vor.u32 %v2419_v44, %v1923_v45  ;;  %v2030_v52 = vor.u32 %v2371_v47, %v2029_v46  ;;  %v1881_v56 = vld [vmem:[%s2769_s18 + $0x20] sm:$0xf] }
  0xcb   : > { %1009 = vmatpush.bf16.msra.mxu2 %v2396_v14  ;;  %v2082_v53 = vor.u32 %v2382_v48, %v2079_v49  ;;  %v2477_v54 = vld [vmem:[%s3366_s2 + $0x118] sm:$0xff]  ;;  %v2410_v57 = vld [vmem:[%s2769_s18 + $0x24] sm:$0xf0]  ;;  %v2421_v59 = vld [vmem:[%s2769_s18 + $0x84] sm:$0xf]  ;;  %s1760_s3 = sshll.u32 (%p321_p1), %s2569_s1, 4  ;;  %s1761_s3 = int_to_ptr.vmem [resolvable:$true] %s1760_s3 }
  0xcc   : > { %2487 = vmatpush.bf16.msra.mxu3 %v2400_v18  ;;  %v2473_v55 = vld [vmem:[%s3366_s2 + $0xf8] sm:$0xff]  ;;  %v1931_v60 = vld [vmem:[%s2769_s18 + $0x88] sm:$0xf0]  ;;  %v2037_v63 = vld [vmem:[%s2776_s22 + $0x20] sm:$0xf]  ;;  %v1882_v3 = vor.u32 %v2410_v57, %v1881_v56 }
  0xcd   : > { %2012 = vmatmul.msk.bf16.vlgmr.msra.gmra.mxu1 %vm615_vm0, %v1910_v20  ;;  %656 = vmatpush.bf16.msra.mxu0 %v2432_v22  ;;  %v2384_v1 = vld [vmem:[%s2776_s22 + $0x84] sm:$0xf]  ;;  %v2472_v7 = vld [vmem:[%s3366_s2 + $0xf0] sm:$0xff]  ;;  %v2471_v9 = vld [vmem:[%s3366_s2 + $0xe8] sm:$0xff] }
  0xce   : > { %1415 = vmatpush.bf16.msrb.mxu1 %v2473_v55  ;;  %v1889_v12 = vld [vmem:[%s2769_s18 + $0x30] sm:$0xf]  ;;  %v2423_v14 = vld [vmem:[%s2769_s18 + $0x94] sm:$0xf]  ;;  %v1939_v15 = vld [vmem:[%s2769_s18 + $0x98] sm:$0xf0] }
  0xcf   : > { %2168 = vmatmul.msk.bf16.vlgmr.msra.gmra.mxu3 %vm615_vm0, %v2066_v21  ;;  %1010 = vmatpush.bf16.msra.mxu2 %v2395_v23  ;;  %v2045_v16 = vld [vmem:[%s2776_s22 + $0x30] sm:$0xf]  ;;  %v2386_v17 = vld [vmem:[%s2776_s22 + $0x94] sm:$0xf]  ;;  %v2095_v19 = vld [vmem:[%s2776_s22 + $0x98] sm:$0xf0]  ;;  %v1942_v21 = vor.u32 %v2423_v14, %v1939_v15 }
  0xd0   : > { %1488 = vmatpush.bf16.msrb.mxu3 %v2477_v54  ;;  %v2098_v23 = vor.u32 %v2386_v17, %v2095_v19  ;;  %v2414_v30 = vld [vmem:[%s2769_s18 + $0x44] sm:$0xf0]  ;;  %v2425_v31 = vld [vmem:[%s2769_s18 + $0xa4] sm:$0xf]  ;;  %v1947_v32 = vld [vmem:[%s2769_s18 + $0xa8] sm:$0xf0] }
  0xd1   : > { %657 = vmatpush.bf16.msra.mxu0 %v2431_v24  ;;  %v2469_v24 = vld [vmem:[%s3366_s2 + $0xd8] sm:$0xff]  ;;  %v2053_v33 = vld [vmem:[%s2776_s22 + $0x40] sm:$0xf]  ;;  %v2377_v34 = vld [vmem:[%s2776_s22 + $0x44] sm:$0xf0] }
  0xd2   : > { %1416 = vmatpush.bf16.msrb.mxu1 %v2472_v7  ;;  %v2388_v35 = vld [vmem:[%s2776_s22 + $0xa4] sm:$0xf]  ;;  %v2103_v36 = vld [vmem:[%s2776_s22 + $0xa8] sm:$0xf0]  ;;  %v1905_v42 = vld [vmem:[%s2769_s18 + $0x50] sm:$0xf] }
  0xd3   : > { %1011 = vmatpush.bf16.msra.mxu2 %v2394_v25  ;;  %v2475_v25 = vld [vmem:[%s3366_s2 + $0x108] sm:$0xff]  ;;  %v2466_v37 = vld [vmem:[%s3366_s2 + $0xc0] sm:$0xff]  ;;  %v2416_v43 = vld [vmem:[%s2769_s18 + $0x54] sm:$0xf0] }
  0xd4   : > { %v2427_v44 = vld [vmem:[%s2769_s18 + $0xb4] sm:$0xf]  ;;  %v1955_v45 = vld [vmem:[%s2769_s18 + $0xb8] sm:$0xf0]  ;;  %v2061_v46 = vld [vmem:[%s2776_s22 + $0x50] sm:$0xf] }
  0xd5   : > { %658 = vmatpush.bf16.msra.mxu0 %v2430_v26  ;;  %v2468_v26 = vld [vmem:[%s3366_s2 + $0xd0] sm:$0xff]  ;;  %v2379_v47 = vld [vmem:[%s2776_s22 + $0x54] sm:$0xf0]  ;;  %v2111_v49 = vld [vmem:[%s2776_s22 + $0xb8] sm:$0xf0] }
  0xd6   : > { %1417 = vmatpush.bf16.msrb.mxu1 %v2471_v9  ;;  %v2390_v48 = vld [vmem:[%s2776_s22 + $0xb4] sm:$0xf]  ;;  %v1913_v54 = vld [vmem:[%s2769_s18 + $0x60] sm:$0xf]  ;;  %v2418_v55 = vld [vmem:[%s2769_s18 + $0x64] sm:$0xf0] }
  0xd7   : > { %1012 = vmatpush.bf16.msra.mxu2 %v2393_v27  ;;  %v2474_v27 = vld [vmem:[%s3366_s2 + $0x100] sm:$0xff]  ;;  %v2077_v7 = vld [vmem:[%s2776_s22 + $0x70] sm:$0xf]  ;;  %v2445_v9 = vld [vmem:[%s2913_s17 + $0x14] sm:$0xf0] }
  0xd8   : > { %v2069_v56 = vld [vmem:[%s2776_s22 + $0x60] sm:$0xf]  ;;  %v2458_v62 = vld [vmem:[%s2913_s17 + $0x84] sm:$0xf] }
  0xd9   : > { %659 = vmatpush.bf16.msra.mxu0 %v2429_v28  ;;  %v2467_v28 = vld [vmem:[%s3366_s2 + $0xc8] sm:$0xff]  ;;  %v2203_v57 = vld [vmem:[%s2913_s17] sm:$0xf] }
  0xdb   : > { %1013 = vmatpush.bf16.msra.mxu2 %v2392_v29  ;;  %v1897_v29 = vld [vmem:[%s2769_s18 + $0x40] sm:$0xf] }
  0xdc   : > { %660 = vmatmul.bf16.vlgmr.msra.gmra.mxu0 %v1866_v38  ;;  %v1898_v38 = vor.u32 %v2414_v30, %v1897_v29 }
  0xdd   : > { %725 = vmatpush.bf16.msrb.mxu0 %v2708_v0  ;;  %2013 = vmatmul.msk.bf16.gmra.mxu1 %vm615_vm0, %v1918_v39  ;;  %v2373_v0 = vld [vmem:[%s2776_s22 + $0x24] sm:$0xf0]  ;;  %v1950_v39 = vor.u32 %v2425_v31, %v1947_v32 }
  0xde   : > { %1014 = vmatmul.bf16.vlgmr.msra.gmra.mxu2 %v2022_v40  ;;  %v2038_v5 = vor.u32 %v2373_v0, %v2037_v63  ;;  %v2054_v40 = vor.u32 %v2377_v34, %v2053_v33  ;;  %v2442_v63 = vld [vmem:[%s2913_s17 + $0x4] sm:$0xf]  ;;  %v2205_v0 = vld [vmem:[%s2913_s17 + $0x8] sm:$0xf0] }
  0xdf   : > { %1079 = vmatpush.bf16.msrb.mxu2 %v2716_v2  ;;  %2169 = vmatmul.msk.bf16.gmra.mxu3 %vm615_vm0, %v2074_v41  ;;  %v2087_v2 = vld [vmem:[%s2776_s22 + $0x88] sm:$0xf0]  ;;  %v2106_v41 = vor.u32 %v2388_v35, %v2103_v36 }
  0xe1   : > { %726 = vmatpush.bf16.msrb.mxu0 %v2725_v4  ;;  %v1934_v4 = vor.u32 %v2421_v59, %v1931_v60  ;;  %v2443_v59 = vld [vmem:[%s2913_s17 + $0x4] sm:$0xf0] }
  0xe2   : > { %v2381_v60 = vld [vmem:[%s2776_s22 + $0x64] sm:$0xf0] }
  0xe3   : > { %1080 = vmatpush.bf16.msrb.mxu2 %v2737_v6  ;;  %v2090_v6 = vor.u32 %v2384_v1, %v2087_v2  ;;  %v1914_v1 = vor.u32 %v2418_v55, %v1913_v54  ;;  %v2204_v2 = vor.u32 %v2443_v59, %v2203_v57 }
  0xe5   : > { %727 = vmatpush.bf16.msrb.mxu0 %v2748_v8  ;;  %v2476_v8 = vld [vmem:[%s3366_s2 + $0x110] sm:$0xff] }
  0xe6   : > { %1489 = vmatpush.bf16.msrb.mxu3 %v2476_v8  ;;  %v2211_v8 = vld [vmem:[%s2913_s17 + $0x10] sm:$0xf] }
  0xe7   : > { %1081 = vmatpush.bf16.msrb.mxu2 %v2401_v10  ;;  %v2470_v10 = vld [vmem:[%s3366_s2 + $0xe0] sm:$0xff]  ;;  %v2212_v15 = vor.u32 %v2445_v9, %v2211_v8 }
  0xe8   : > { %1418 = vmatpush.bf16.msrb.mxu1 %v2470_v10  ;;  %v2383_v10 = vld [vmem:[%s2776_s22 + $0x74] sm:$0xf0] }
  0xe9   : > { %728 = vmatpush.bf16.msrb.mxu0 %v2763_v13  ;;  %v2412_v13 = vld [vmem:[%s2769_s18 + $0x34] sm:$0xf0] }
  0xea   : > { %v1890_v20 = vor.u32 %v2412_v13, %v1889_v12  ;;  %1490 = vmatpush.bf16.msrb.mxu3 %v2475_v25  ;;  %v2444_v12 = vld [vmem:[%s2913_s17 + $0x14] sm:$0xf]  ;;  %v2213_v13 = vld [vmem:[%s2913_s17 + $0x18] sm:$0xf0]  ;;  %v2447_v25 = vld [vmem:[%s2913_s17 + $0x24] sm:$0xf0] }
  0xeb   : > { %1082 = vmatpush.bf16.msrb.mxu2 %v2400_v18  ;;  %v2375_v18 = vld [vmem:[%s2776_s22 + $0x34] sm:$0xf0]  ;;  %v2216_v17 = vor.u32 %v2444_v12, %v2213_v13 }
  0xec   : > { %665 = vmatmul.bf16.gmra.mxu0 %v1874_v50  ;;  %v2046_v22 = vor.u32 %v2375_v18, %v2045_v16  ;;  %1419 = vmatpush.bf16.msrb.mxu1 %v2469_v24  ;;  %v1906_v50 = vor.u32 %v2416_v43, %v1905_v42  ;;  %v2078_v18 = vor.u32 %v2383_v10, %v2077_v7  ;;  %v2219_v24 = vld [vmem:[%s2913_s17 + $0x20] sm:$0xf]  ;;  %v2093_v42 = vld [vmem:[%s2776_s22 + $0x90] sm:$0xf] }
  0xed   : > { %2014 = vmatmul.msk.bf16.gmra.mxu1 %vm615_vm0, %v1926_v51  ;;  %v1958_v51 = vor.u32 %v2427_v44, %v1955_v45  ;;  %v2220_v31 = vor.u32 %v2447_v25, %v2219_v24  ;;  %v2227_v43 = vld [vmem:[%s2913_s17 + $0x30] sm:$0xf]  ;;  %v2449_v44 = vld [vmem:[%s2913_s17 + $0x34] sm:$0xf0] }
  0xee   : > { %1019 = vmatmul.bf16.gmra.mxu2 %v2030_v52  ;;  %1491 = vmatpush.bf16.msrb.mxu3 %v2474_v27  ;;  %v2062_v52 = vor.u32 %v2379_v47, %v2061_v46  ;;  %v2446_v27 = vld [vmem:[%s2913_s17 + $0x24] sm:$0xf]  ;;  %v2387_v45 = vld [vmem:[%s2776_s22 + $0x94] sm:$0xf0]  ;;  %v2448_v46 = vld [vmem:[%s2913_s17 + $0x34] sm:$0xf] }
  0xef   : > { %2170 = vmatmul.msk.bf16.gmra.mxu3 %vm615_vm0, %v2082_v53  ;;  %v2114_v53 = vor.u32 %v2390_v48, %v2111_v49  ;;  %v2229_v47 = vld [vmem:[%s2913_s17 + $0x38] sm:$0xf0]  ;;  %v2094_v54 = vor.u32 %v2387_v45, %v2093_v42  ;;  %v2428_v24 = vld [vmem:[%s2769_s18 + $0xb4] sm:$0xf0]  ;;  %v2109_v25 = vld [vmem:[%s2776_s22 + $0xb0] sm:$0xf] }
  0xf0   : > { %1420 = vmatpush.bf16.msrb.mxu1 %v2468_v26  ;;  %v2385_v26 = vld [vmem:[%s2776_s22 + $0x84] sm:$0xf0]  ;;  %v2232_v55 = vor.u32 %v2448_v46, %v2229_v47 }
  0xf4   : > { %1421 = vmatpush.bf16.msrb.mxu1 %v2467_v28  ;;  %v2221_v28 = vld [vmem:[%s2913_s17 + $0x28] sm:$0xf0] }
  0xf5   : > { %v2224_v35 = vor.u32 %v2446_v27, %v2221_v28  ;;  %v2453_v27 = vld [vmem:[%s2913_s17 + $0x54] sm:$0xf0] }
  0xf6   : > { %v2391_v28 = vld [vmem:[%s2776_s22 + $0xb4] sm:$0xf0] }
  0xf8   : > { %1422 = vmatpush.bf16.msrb.mxu1 %v2466_v37 }
  0xfc   : > { %670 = vmatmul.bf16.gmra.mxu0 %v1882_v3  ;;  %v2070_v3 = vor.u32 %v2381_v60, %v2069_v56 }
  0xfd   : > { %2015 = vmatmul.msk.bf16.gmra.mxu1 %vm615_vm0, %v1934_v4  ;;  %v2208_v4 = vor.u32 %v2442_v63, %v2205_v0  ;;  %v1945_v63 = vld [vmem:[%s2769_s18 + $0xa0] sm:$0xf]  ;;  %v2426_v0 = vld [vmem:[%s2769_s18 + $0xa4] sm:$0xf0] }
  0xfe   : > { %1024 = vmatmul.bf16.gmra.mxu2 %v2038_v5  ;;  %v1921_v5 = vld [vmem:[%s2769_s18 + $0x70] sm:$0xf]  ;;  %v1946_v9 = vor.u32 %v2426_v0, %v1945_v63  ;;  %v2368_v63 = vld [vmem:[%s2776_s22 + $0x4] sm:$0xf]  ;;  %v2251_v0 = vld [vmem:[%s2913_s17 + $0x60] sm:$0xf] }
  0xff   : > { %2171 = vmatmul.msk.bf16.gmra.mxu3 %vm615_vm0, %v2090_v6  ;;  %v2420_v6 = vld [vmem:[%s2769_s18 + $0x74] sm:$0xf0] }
 0x100   : > { %v1922_v14 = vor.u32 %v2420_v6, %v1921_v5  ;;  %v2450_v5 = vld [vmem:[%s2913_s17 + $0x44] sm:$0xf]  ;;  %v2237_v6 = vld [vmem:[%s2913_s17 + $0x48] sm:$0xf0] }
 0x10c   : > { %675 = vmatmul.bf16.gmra.mxu0 %v1890_v20 }
 0x10d   : > { %2016 = vmatmul.msk.bf16.gmra.mxu1 %vm615_vm0, %v1942_v21  ;;  %v1929_v21 = vld [vmem:[%s2769_s18 + $0x80] sm:$0xf] }
 0x10e   : > { %1029 = vmatmul.bf16.gmra.mxu2 %v2046_v22  ;;  %v2422_v22 = vld [vmem:[%s2769_s18 + $0x84] sm:$0xf0] }
 0x10f   : > { %2172 = vmatmul.msk.bf16.gmra.mxu3 %vm615_vm0, %v2098_v23  ;;  %v2085_v23 = vld [vmem:[%s2776_s22 + $0x80] sm:$0xf]  ;;  %v1930_v30 = vor.u32 %v2422_v22, %v1929_v21 }
 0x110   : > { %v2086_v34 = vor.u32 %v2385_v26, %v2085_v23  ;;  %v1953_v23 = vld [vmem:[%s2769_s18 + $0xb0] sm:$0xf] }
 0x111   : > { %v2243_v26 = vld [vmem:[%s2913_s17 + $0x50] sm:$0xf] }
 0x11c   : > { %680 = vmatmul.bf16.gmra.mxu0 %v1898_v38 }
 0x11d   : > { %2017 = vmatmul.msk.bf16.gmra.mxu1 %vm615_vm0, %v1950_v39 }
 0x11e   : > { %1034 = vmatmul.bf16.gmra.mxu2 %v2054_v40  ;;  %v1937_v40 = vld [vmem:[%s2769_s18 + $0x90] sm:$0xf] }
 0x11f   : > { %2173 = vmatmul.msk.bf16.gmra.mxu3 %vm615_vm0, %v2106_v41  ;;  %v2424_v41 = vld [vmem:[%s2769_s18 + $0x94] sm:$0xf0] }
 0x12c   : > { %685 = vmatmul.bf16.gmra.mxu0 %v1906_v50  ;;  %v1938_v50 = vor.u32 %v2424_v41, %v1937_v40  ;;  %v1954_v40 = vor.u32 %v2428_v24, %v1953_v23  ;;  %v2244_v41 = vor.u32 %v2453_v27, %v2243_v26 }
 0x12d   : > { %2018 = vmatmul.msk.bf16.gmra.mxu1 %vm615_vm0, %v1958_v51  ;;  %v2228_v51 = vor.u32 %v2449_v44, %v2227_v43  ;;  %v2110_v44 = vor.u32 %v2391_v28, %v2109_v25 }
 0x12e   : > { %1039 = vmatmul.bf16.gmra.mxu2 %v2062_v52 }
 0x12f   : > { %2174 = vmatmul.msk.bf16.gmra.mxu3 %vm615_vm0, %v2114_v53 }
 0x13c   : > { %690 = vmatmul.bf16.gmra.mxu0 %v1914_v1  ;;  %v2101_v1 = vld [vmem:[%s2776_s22 + $0xa0] sm:$0xf] }
 0x13d   : > { %1423 = vmatmul.bf16.vlgmr.msrb.gmra.mxu1 %v2204_v2  ;;  %v2235_v2 = vld [vmem:[%s2913_s17 + $0x40] sm:$0xf] }
 0x13e   : > { %1044 = vmatmul.bf16.gmra.mxu2 %v2070_v3  ;;  %v2451_v3 = vld [vmem:[%s2913_s17 + $0x44] sm:$0xf0] }
 0x13f   : > { %2345 = vmatmul.msk.bf16.vlgmr.msrb.gmra.mxu3 %vm615_vm0, %v2208_v4  ;;  %v2389_v4 = vld [vmem:[%s2776_s22 + $0xa4] sm:$0xf0]  ;;  %v2236_v10 = vor.u32 %v2451_v3, %v2235_v2  ;;  %v2023_v2 = vld [vmem:[%s2776_s22 + $0x8] sm:$0xf0]  ;;  %v2454_v3 = vld [vmem:[%s2913_s17 + $0x64] sm:$0xf] }
 0x140   : > { %v2026_v23 = vor.u32 %v2368_v63, %v2023_v2 }
 0x14a   : > { %v2929_v16 = vpop.f32.mrf.mxu1 }
 0x14c   : > { %695 = vmatmul.bf16.gmra.mxu0 %v1922_v14  ;;  %v2102_v14 = vor.u32 %v2389_v4, %v2101_v1  ;;  %v2455_v1 = vld [vmem:[%s2913_s17 + $0x64] sm:$0xf0]  ;;  %v2253_v4 = vld [vmem:[%s2913_s17 + $0x68] sm:$0xf0] }
 0x14d   : > { %1428 = vmatmul.bf16.gmra.mxu1 %v2212_v15  ;;  %v2240_v15 = vor.u32 %v2450_v5, %v2237_v6  ;;  %v2256_v24 = vor.u32 %v2454_v3, %v2253_v4 }
 0x14e   : > { %1049 = vmatmul.bf16.gmra.mxu2 %v2078_v18 }
 0x14f   : > { %2346 = vmatmul.msk.bf16.gmra.mxu3 %vm615_vm0, %v2216_v17 }
 0x152   : > { %v2932_v19 = vpop.f32.mrf.mxu3  ;;  %v2934_v20 = vpop.f32.mrf.mxu1 }
 0x159   : > { %v2946_v32 = vpop.f32.mrf.mxu0 }
 0x15a   : > { %v2944_v29 = vpop.f32.mrf.mxu3  ;;  %v2948_v33 = vpop.f32.mrf.mxu1 }
 0x15c   : > { %700 = vmatmul.bf16.gmra.mxu0 %v1930_v30  ;;  %v2452_v30 = vld [vmem:[%s2913_s17 + $0x54] sm:$0xf] }
 0x15d   : > { %1433 = vmatmul.bf16.gmra.mxu1 %v2220_v31  ;;  %v2245_v31 = vld [vmem:[%s2913_s17 + $0x58] sm:$0xf0] }
 0x15e   : > { %1054 = vmatmul.bf16.gmra.mxu2 %v2086_v34  ;;  %v2248_v45 = vor.u32 %v2452_v30, %v2245_v31  ;;  %v2407_v30 = vld [vmem:[%s2769_s18 + $0x14] sm:$0xf]  ;;  %v1875_v31 = vld [vmem:[%s2769_s18 + $0x18] sm:$0xf0] }
 0x15f   : > { %2347 = vmatmul.msk.bf16.gmra.mxu3 %vm615_vm0, %v2224_v35 }
 0x161   : > { %v2951_v36 = vpop.f32.mrf.mxu2  ;;  %v2955_v38 = vpop.f32.mrf.mxu0 }
 0x162   : > { %v2953_v37 = vpop.f32.mrf.mxu3  ;;  %v2957_v39 = vpop.f32.mrf.mxu1 }
 0x169   : > { %v2967_v48 = vpop.f32.mrf.mxu2  ;;  %v2971_v52 = vpop.f32.mrf.mxu0 }
 0x16a   : > { %v2969_v49 = vpop.f32.mrf.mxu3  ;;  %v2973_v53 = vpop.f32.mrf.mxu1 }
 0x16c   : > { %705 = vmatmul.bf16.gmra.mxu0 %v1938_v50 }
 0x16d   : > { %1438 = vmatmul.bf16.gmra.mxu1 %v2228_v51 }
 0x16e   : > { %1059 = vmatmul.bf16.gmra.mxu2 %v2094_v54  ;;  %v2405_v54 = vld [vmem:[%s2769_s18 + $0x4] sm:$0xf] }
 0x16f   : > { %2348 = vmatmul.msk.bf16.gmra.mxu3 %vm615_vm0, %v2232_v55  ;;  %v1867_v55 = vld [vmem:[%s2769_s18 + $0x8] sm:$0xf0] }
 0x171   : > { %v2976_v56 = vpop.f32.mrf.mxu2  ;;  %v2980_v59 = vpop.f32.mrf.mxu0 }
 0x172   : > { %v2978_v57 = vpop.f32.mrf.mxu3  ;;  %v2982_v60 = vpop.f32.mrf.mxu1 }
 0x179   : > { %v2992_v7 = vpop.f32.mrf.mxu2  ;;  %v2996_v12 = vpop.f32.mrf.mxu0 }
 0x17a   : > { %3379 = vst [vmem:[#allocation9_spill] sm:$0xff] %v2992_v7  ;;  %v2994_v8 = vpop.f32.mrf.mxu3  ;;  %v2998_v13 = vpop.f32.mrf.mxu1 }
 0x17c   : > { %710 = vmatmul.bf16.gmra.mxu0 %v1946_v9  ;;  %v1870_v9 = vor.u32 %v2405_v54, %v1867_v55  ;;  %v2456_v54 = vld [vmem:[%s2913_s17 + $0x74] sm:$0xf]  ;;  %v2261_v55 = vld [vmem:[%s2913_s17 + $0x78] sm:$0xf0] }
 0x17d   : > { %1443 = vmatmul.bf16.gmra.mxu1 %v2236_v10  ;;  %v2252_v10 = vor.u32 %v2455_v1, %v2251_v0  ;;  %v1878_v1 = vor.u32 %v2407_v30, %v1875_v31 }
 0x17e   : > { %1064 = vmatmul.bf16.gmra.mxu2 %v2102_v14 }
 0x17f   : > { %2349 = vmatmul.msk.bf16.gmra.mxu3 %vm615_vm0, %v2240_v15 }
 0x181   : > { %v3001_v18 = vpop.f32.mrf.mxu2  ;;  %v3005_v21 = vpop.f32.mrf.mxu0 }
 0x182   : > { %3380 = vst [vmem:[#allocation10_spill] sm:$0xff] %v3001_v18  ;;  %v3003_v17 = vpop.f32.mrf.mxu3  ;;  %v3007_v22 = vpop.f32.mrf.mxu1 }
 0x189   : > { %v3017_v34 = vpop.f32.mrf.mxu2  ;;  %v3021_v42 = vpop.f32.mrf.mxu0 }
 0x18a   : > { %3381 = vst [vmem:[#allocation11_spill] sm:$0xff] %v3017_v34  ;;  %v3019_v35 = vpop.f32.mrf.mxu3  ;;  %v3023_v43 = vpop.f32.mrf.mxu1 }
 0x18b   : > { %3382 = vst [vmem:[#allocation12_spill] sm:$0xff] %v3019_v35 }
 0x18c   : > { %715 = vmatmul.bf16.gmra.mxu0 %v1954_v40  ;;  %v2370_v40 = vld [vmem:[%s2776_s22 + $0x14] sm:$0xf] }
 0x18d   : > { %1448 = vmatmul.bf16.gmra.mxu1 %v2244_v41  ;;  %v2259_v41 = vld [vmem:[%s2913_s17 + $0x70] sm:$0xf] }
 0x18e   : > { %1069 = vmatmul.bf16.gmra.mxu2 %v2110_v44  ;;  %v2457_v44 = vld [vmem:[%s2913_s17 + $0x74] sm:$0xf0] }
 0x18f   : > { %2350 = vmatmul.msk.bf16.gmra.mxu3 %vm615_vm0, %v2248_v45  ;;  %v2031_v45 = vld [vmem:[%s2776_s22 + $0x18] sm:$0xf0]  ;;  %v2260_v2 = vor.u32 %v2457_v44, %v2259_v41  ;;  %v2409_v41 = vld [vmem:[%s2769_s18 + $0x24] sm:$0xf]  ;;  %v1883_v44 = vld [vmem:[%s2769_s18 + $0x28] sm:$0xf0] }
 0x191   : > { %v3026_v46 = vpop.f32.mrf.mxu2  ;;  %v3030_v50 = vpop.f32.mrf.mxu0 }
 0x192   : > { %v3028_v47 = vpop.f32.mrf.mxu3  ;;  %v3032_v51 = vpop.f32.mrf.mxu1 }
 0x193   : > { %3383 = vst [vmem:[#allocation13_spill] sm:$0xff] %v3028_v47 }
 0x199   : > { %v3042_v5 = vpop.f32.mrf.mxu2  ;;  %v3046_v14 = vpop.f32.mrf.mxu0 }
 0x19a   : > { %v3044_v6 = vpop.f32.mrf.mxu3  ;;  %v3048_v15 = vpop.f32.mrf.mxu1 }
 0x19b   : > { %3384 = vst [vmem:[#allocation14_spill] sm:$0xff] %v3044_v6 }
 0x19c   : > { %2007 = vmatmul.msk.bf16.vlgmr.msrb.gmra.mxu0 %vm615_vm0, %v1870_v9  ;;  %v2034_v9 = vor.u32 %v2370_v40, %v2031_v45  ;;  %v2372_v40 = vld [vmem:[%s2776_s22 + $0x24] sm:$0xf]  ;;  %v2267_v45 = vld [vmem:[%s2913_s17 + $0x80] sm:$0xf] }
 0x19d   : > { %1453 = vmatmul.bf16.gmra.mxu1 %v2252_v10  ;;  %v2264_v10 = vor.u32 %v2456_v54, %v2261_v55  ;;  %v2459_v54 = vld [vmem:[%s2913_s17 + $0x84] sm:$0xf0]  ;;  %v2039_v55 = vld [vmem:[%s2776_s22 + $0x28] sm:$0xf0] }
 0x19e   : > { %2163 = vmatmul.msk.bf16.vlgmr.msrb.gmra.mxu2 %vm615_vm0, %v2026_v23  ;;  %v2268_v58 = vor.u32 %v2459_v54, %v2267_v45  ;;  %v2411_v54 = vld [vmem:[%s2769_s18 + $0x34] sm:$0xf] }
 0x19f   : > { %2351 = vmatmul.msk.bf16.gmra.mxu3 %vm615_vm0, %v2256_v24 }
 0x1a1   : > { %v3053_v25 = vpop.f32.mrf.mxu2  ;;  %v3057_v27 = vpop.f32.mrf.mxu0 }
 0x1a2   : > { %v3055_v26 = vpop.f32.mrf.mxu3  ;;  %v3059_v28 = vpop.f32.mrf.mxu1 }
 0x1a3   : > { %3385 = vst [vmem:[#allocation15_spill] sm:$0xff] %v3055_v26 }
 0x1a9   : > { %v3069_v63 = vpop.f32.mrf.mxu2  ;;  %v3073_v3 = vpop.f32.mrf.mxu0 }
 0x1aa   : > { %3386 = vst [vmem:[#allocation16_spill] sm:$0xff] %v3069_v63  ;;  %v3071_v0 = vpop.f32.mrf.mxu3  ;;  %v3075_v4 = vpop.f32.mrf.mxu1 }
 0x1ab   : > { %3387 = vst [vmem:[#allocation17_spill] sm:$0xff] %v3071_v0 }
 0x1ac   : > { %2008 = vmatmul.msk.bf16.gmra.mxu0 %vm615_vm0, %v1878_v1  ;;  %v2269_v1 = vld [vmem:[%s2913_s17 + $0x88] sm:$0xf0] }
 0x1ad   : > { %1458 = vmatmul.bf16.gmra.mxu1 %v2260_v2  ;;  %v2272_v26 = vor.u32 %v2458_v62, %v2269_v1  ;;  %v2374_v1 = vld [vmem:[%s2776_s22 + $0x34] sm:$0xf] }
 0x1ae   : > { %2164 = vmatmul.msk.bf16.gmra.mxu2 %vm615_vm0, %v2034_v9 }
 0x1af   : > { %2352 = vmatmul.msk.bf16.gmra.mxu3 %vm615_vm0, %v2264_v10  ;;  %v1886_v10 = vor.u32 %v2409_v41, %v1883_v44 }
 0x1b1   : > { %v3080_v23 = vpop.f32.mrf.mxu2  ;;  %v688_v30 = vpop.f32.mrf.mxu0 }
 0x1b2   : > { %v3082_v24 = vpop.f32.mrf.mxu3  ;;  %v3084_v31 = vpop.f32.mrf.mxu1  ;;  %v758_v2 = vadd.f32 %v2934_v20, %v688_v30 }
 0x1b3   : > { %3388 = vst [vmem:[#allocation18_spill] sm:$0xff] %v3082_v24  ;;  %v2042_v24 = vor.u32 %v2372_v40, %v2039_v55  ;;  %v1891_v55 = vld [vmem:[%s2769_s18 + $0x38] sm:$0xf0] }
 0x1b9   : > { %v1042_v9 = vpop.f32.mrf.mxu2  ;;  %v691_v47 = vpop.f32.mrf.mxu0 }
 0x1ba   : > { %v3095_v61 = vpop.f32.mrf.mxu3  ;;  %v3097_v35 = vadd.f32 %v1042_v9, %v758_v2  ;;  %v1424_v0 = vpop.f32.mrf.mxu1  ;;  %v761_v20 = vadd.f32 %v2948_v33, %v691_v47  ;;  %v2461_v2 = vld [vmem:[%s2913_s17 + $0x94] sm:$0xf0]  ;;  %v2047_v9 = vld [vmem:[%s2776_s22 + $0x38] sm:$0xf0]  ;;  %v1894_v47 = vor.u32 %v2411_v54, %v1891_v55 }
 0x1bb   : > { %3389 = vst [vmem:[#allocation19_spill] sm:$0xff] %v3095_v61  ;;  %v2050_v7 = vor.u32 %v2374_v1, %v2047_v9  ;;  %v2376_v9 = vld [vmem:[%s2776_s22 + $0x44] sm:$0xf] }
 0x1bc   : > { %2009 = vmatmul.msk.bf16.gmra.mxu0 %vm615_vm0, %v1886_v10  ;;  %v2277_v10 = vld [vmem:[%s2913_s17 + $0x98] sm:$0xf0] }
 0x1bd   : > { %1463 = vmatmul.bf16.gmra.mxu1 %v2268_v58  ;;  %v2275_v58 = vld [vmem:[%s2913_s17 + $0x90] sm:$0xf] }
 0x1be   : > { %2165 = vmatmul.msk.bf16.gmra.mxu2 %vm615_vm0, %v2042_v24  ;;  %v2460_v24 = vld [vmem:[%s2913_s17 + $0x94] sm:$0xf]  ;;  %v2276_v6 = vor.u32 %v2461_v2, %v2275_v58  ;;  %v2413_v58 = vld [vmem:[%s2769_s18 + $0x44] sm:$0xf]  ;;  %v1899_v2 = vld [vmem:[%s2769_s18 + $0x48] sm:$0xf0] }
 0x1bf   : > { %2353 = vmatmul.msk.bf16.gmra.mxu3 %vm615_vm0, %v2272_v26  ;;  %v2280_v18 = vor.u32 %v2460_v24, %v2277_v10  ;;  %v2463_v24 = vld [vmem:[%s2913_s17 + $0xa4] sm:$0xf0]  ;;  %v2055_v10 = vld [vmem:[%s2776_s22 + $0x48] sm:$0xf0] }
 0x1c0   : > { %v2058_v63 = vor.u32 %v2376_v9, %v2055_v10  ;;  %v2291_v9 = vld [vmem:[%s2913_s17 + $0xb0] sm:$0xf]  ;;  %v2465_v10 = vld [vmem:[%s2913_s17 + $0xb4] sm:$0xf0] }
 0x1c1   : > { %v1045_v30 = vpop.f32.mrf.mxu2  ;;  %v693_v62 = vpop.f32.mrf.mxu0 }
 0x1c2   : > { %v1493_v41 = vpop.f32.mrf.mxu3  ;;  %v3103_v44 = vadd.f32 %v1045_v30, %v761_v20  ;;  %v1426_v45 = vpop.f32.mrf.mxu1  ;;  %v763_v26 = vadd.f32 %v2957_v39, %v693_v62 }
 0x1c3   : > { %v3105_v40 = vadd.f32 %v1493_v41, %v1424_v0 }
 0x1c9   : > { %v1047_v61 = vpop.f32.mrf.mxu2  ;;  %v696_v30 = vpop.f32.mrf.mxu0 }
 0x1ca   : > { %v1495_v33 = vpop.f32.mrf.mxu3  ;;  %v3116_v20 = vadd.f32 %v1047_v61, %v763_v26  ;;  %v1429_v41 = vpop.f32.mrf.mxu1  ;;  %v766_v61 = vadd.f32 %v2973_v53, %v696_v30  ;;  %v2285_v26 = vld [vmem:[%s2913_s17 + $0xa8] sm:$0xf0] }
 0x1cb   : > { %v3118_v0 = vadd.f32 %v1495_v33, %v1426_v45 }
 0x1cc   : > { %2010 = vmatmul.msk.bf16.gmra.mxu0 %vm615_vm0, %v1894_v47  ;;  %v1902_v47 = vor.u32 %v2413_v58, %v1899_v2 }
 0x1cd   : > { %1468 = vmatmul.bf16.gmra.mxu1 %v2276_v6  ;;  %v2283_v6 = vld [vmem:[%s2913_s17 + $0xa0] sm:$0xf] }
 0x1ce   : > { %2166 = vmatmul.msk.bf16.gmra.mxu2 %vm615_vm0, %v2050_v7  ;;  %v2462_v7 = vld [vmem:[%s2913_s17 + $0xa4] sm:$0xf]  ;;  %v2284_v30 = vor.u32 %v2463_v24, %v2283_v6 }
 0x1cf   : > { %2354 = vmatmul.msk.bf16.gmra.mxu3 %vm615_vm0, %v2280_v18  ;;  %v2288_v34 = vor.u32 %v2462_v7, %v2285_v26  ;;  %v2464_v7 = vld [vmem:[%s2913_s17 + $0xb4] sm:$0xf]  ;;  %v2293_v26 = vld [vmem:[%s2913_s17 + $0xb8] sm:$0xf0] }
 0x1d1   : > { %v1050_v39 = vpop.f32.mrf.mxu2  ;;  %v698_v55 = vpop.f32.mrf.mxu0 }
 0x1d2   : > { %v1498_v62 = vpop.f32.mrf.mxu3  ;;  %v3124_v45 = vadd.f32 %v1050_v39, %v766_v61  ;;  %v1431_v1 = vpop.f32.mrf.mxu1  ;;  %v768_v18 = vadd.f32 %v2982_v60, %v698_v55 }
 0x1d3   : > { %v3126_v54 = vadd.f32 %v1498_v62, %v1429_v41 }
 0x1d9   : > { %v1052_v33 = vpop.f32.mrf.mxu2  ;;  %v701_v39 = vpop.f32.mrf.mxu0 }
 0x1da   : > { %v1500_v53 = vpop.f32.mrf.mxu3  ;;  %v3137_v61 = vadd.f32 %v1052_v33, %v768_v18  ;;  %v1434_v62 = vpop.f32.mrf.mxu1  ;;  %v771_v60 = vadd.f32 %v2998_v13, %v701_v39  ;;  %v2296_v39 = vor.u32 %v2464_v7, %v2293_v26 }
 0x1db   : > { %v3139_v41 = vadd.f32 %v1500_v53, %v1431_v1  ;;  %v2292_v53 = vor.u32 %v2465_v10, %v2291_v9 }
 0x1dc   : > { %2011 = vmatmul.msk.bf16.gmra.mxu0 %vm615_vm0, %v1902_v47 }
 0x1dd   : > { %1473 = vmatmul.bf16.gmra.mxu1 %v2284_v30 }
 0x1de   : > { %2167 = vmatmul.msk.bf16.gmra.mxu2 %vm615_vm0, %v2058_v63 }
 0x1df   : > { %2355 = vmatmul.msk.bf16.gmra.mxu3 %vm615_vm0, %v2288_v34 }
 0x1e1   : > { %v1055_v55 = vpop.f32.mrf.mxu2  ;;  %v703_v6 = vpop.f32.mrf.mxu0 }
 0x1e2   : > { %v1503_v1 = vpop.f32.mrf.mxu3  ;;  %v3145_v58 = vadd.f32 %v1055_v55, %v771_v60  ;;  %v1436_v24 = vpop.f32.mrf.mxu1  ;;  %v773_v18 = vadd.f32 %v3007_v22, %v703_v6 }
 0x1e3   : > { %v3147_v2 = vadd.f32 %v1503_v1, %v1434_v62 }
 0x1e9   : > { %v1057_v33 = vpop.f32.mrf.mxu2  ;;  %v706_v47 = vpop.f32.mrf.mxu0 }
 0x1ea   : > { %v1505_v63 = vpop.f32.mrf.mxu3  ;;  %v3154_v34 = vadd.f32 %v1057_v33, %v773_v18  ;;  %v1439_v30 = vpop.f32.mrf.mxu1  ;;  %v776_v62 = vadd.f32 %v3023_v43, %v706_v47 }
 0x1eb   : > { %v3156_v13 = vadd.f32 %v1505_v63, %v1436_v24 }
 0x1ec   : > { %3390 = vst [vmem:[#allocation20_spill] sm:$0xff] %v3154_v34 }
 0x1ed   : > { %1478 = vmatmul.bf16.gmra.mxu1 %v2292_v53 }
 0x1ef   : > { %2356 = vmatmul.msk.bf16.gmra.mxu3 %vm615_vm0, %v2296_v39 }
 0x1f1   : > { %v1060_v60 = vpop.f32.mrf.mxu2  ;;  %v708_v6 = vpop.f32.mrf.mxu0 }
 0x1f2   : > { %v1508_v55 = vpop.f32.mrf.mxu3  ;;  %v3160_v1 = vadd.f32 %v1060_v60, %v776_v62  ;;  %v1441_v9 = vpop.f32.mrf.mxu1  ;;  %v778_v10 = vadd.f32 %v3032_v51, %v708_v6 }
 0x1f3   : > { %v3162_v22 = vadd.f32 %v1508_v55, %v1439_v30 }
 0x1f4   : > { %3391 = vst [vmem:[#allocation21_spill] sm:$0xff] %v3160_v1 }
 0x1f9   : > { %v1062_v24 = vpop.f32.mrf.mxu2  ;;  %v711_v26 = vpop.f32.mrf.mxu0 }
 0x1fa   : > { %v1510_v18 = vpop.f32.mrf.mxu3  ;;  %v3165_v33 = vadd.f32 %v1062_v24, %v778_v10  ;;  %v1444_v63 = vpop.f32.mrf.mxu1  ;;  %v781_v43 = vadd.f32 %v3048_v15, %v711_v26 }
 0x1fb   : > { %v3167_v7 = vadd.f32 %v1510_v18, %v1441_v9 }
 0x1fc   : > { %3392 = vst [vmem:[#allocation22_spill] sm:$0xff] %v3165_v33 }
 0x201   : > { %v1065_v53 = vpop.f32.mrf.mxu2  ;;  %v713_v62 = vpop.f32.mrf.mxu0 }
 0x202   : > { %v1513_v47 = vpop.f32.mrf.mxu3  ;;  %v3170_v39 = vadd.f32 %v1065_v53, %v781_v43  ;;  %v1446_v60 = vpop.f32.mrf.mxu1  ;;  %v783_v51 = vadd.f32 %v3059_v28, %v713_v62 }
 0x203   : > { %v3172_v30 = vadd.f32 %v1513_v47, %v1444_v63 }
 0x204   : > { %3393 = vst [vmem:[#allocation23_spill] sm:$0xff] %v3170_v39 }
 0x209   : > { %v1067_v55 = vpop.f32.mrf.mxu2  ;;  %v716_v24 = vpop.f32.mrf.mxu0 }
 0x20a   : > { %v1515_v6 = vpop.f32.mrf.mxu3  ;;  %v3175_v10 = vadd.f32 %v1067_v55, %v783_v51  ;;  %v1449_v18 = vpop.f32.mrf.mxu1  ;;  %v786_v15 = vadd.f32 %v3075_v4, %v716_v24 }
 0x20b   : > { %v3177_v9 = vadd.f32 %v1515_v6, %v1446_v60 }
 0x20c   : > { %3394 = vst [vmem:[#allocation24_spill] sm:$0xff] %v3175_v10 }
 0x211   : > { %v1070_v26 = vpop.f32.mrf.mxu2  ;;  %v718_v63 = vpop.f32.mrf.mxu0 }
 0x212   : > { %v1518_v34 = vpop.f32.mrf.mxu3  ;;  %v3180_v43 = vadd.f32 %v1070_v26, %v786_v15  ;;  %v1451_v53 = vpop.f32.mrf.mxu1  ;;  %v788_v47 = vadd.f32 %v3084_v31, %v718_v63 }
 0x214   : > { %3395 = vst [vmem:[#allocation25_spill] sm:$0xff] %v3180_v43 }
 0x219   : > { %v1072_v1 = vpop.f32.mrf.mxu2  ;;  %v730_v51 = vpop.f32.mrf.mxu0 }
 0x21a   : > { %v1520_v28 = vpop.f32.mrf.mxu3  ;;  %v3183_v62 = vadd.f32 %v1072_v1, %v788_v47  ;;  %v1454_v55 = vpop.f32.mrf.mxu1  ;;  %v731_v60 = vadd.f32 %v730_v51, %v2946_v32 }
 0x21c   : > { %3396 = vst [vmem:[#allocation26_spill] sm:$0xff] %v3183_v62  ;;  %v1016_v6 = vadd.f32 %v2951_v36, %v731_v60 }
 0x221   : > { %v1084_v10 = vpop.f32.mrf.mxu2  ;;  %v732_v39 = vpop.f32.mrf.mxu0 }
 0x222   : > { %v1523_v4 = vpop.f32.mrf.mxu3  ;;  %v1085_v24 = vadd.f32 %v1084_v10, %v1016_v6  ;;  %v1456_v15 = vpop.f32.mrf.mxu1  ;;  %v733_v31 = vadd.f32 %v732_v39, %v2955_v38 }
 0x224   : > { %v3188_v26 = vadd.f32 %v3105_v40, %v1085_v24  ;;  %v1018_v63 = vadd.f32 %v2967_v48, %v733_v31  ;;  %v1120_v24 = vadd.f32 %v2978_v57, %v3124_v45  ;;  %v3216_v45 = vperm.slane %v2684_v11, 0  ;;  %v1723_v11 = vld [vmem:[%s3368_s4 + $0x18] sm:$0xff] (%p321_p1) }
 0x229   : > { %v1086_v1 = vpop.f32.mrf.mxu2  ;;  %v735_v43 = vpop.f32.mrf.mxu0 }
 0x22a   : > { %v1525_v47 = vpop.f32.mrf.mxu3  ;;  %v1087_v62 = vadd.f32 %v1086_v1, %v1018_v63  ;;  %v1459_v33 = vpop.f32.mrf.mxu1  ;;  %v736_v36 = vadd.f32 %v735_v43, %v2971_v52  ;;  %v1117_v52 = vadd.f32 %v2969_v49, %v3116_v20  ;;  %v1115_v63 = vadd.f32 %v2953_v37, %v3103_v44 }
 0x22b   : > { %v1526_v31 = vadd.f32 %v1525_v47, %v1456_v15 }
 0x22c   : > { %v3193_v32 = vadd.f32 %v3118_v0, %v1087_v62  ;;  %v1021_v10 = vadd.f32 %v2976_v56, %v736_v36  ;;  %v756_v0 = vadd.f32 %v2929_v16, %v3073_v3  ;;  %v1524_v56 = vadd.f32 %v1523_v4, %v1454_v55 }
 0x22d   : > { %v1521_v16 = vadd.f32 %v1520_v28, %v1451_v53  ;;  %v1566_v3 = vadd.f32 %v1526_v31, %v1117_v52  ;;  %v1519_v55 = vadd.f32 %v1518_v34, %v1449_v18 }
 0x22e   : > { %v1041_v62 = vadd.f32 %v3080_v23, %v756_v0  ;;  %v1112_v23 = vadd.f32 %v2944_v29, %v3097_v35  ;;  %v1565_v37 = vadd.f32 %v1524_v56, %v1115_v63  ;;  %v1125_v29 = vadd.f32 %v3003_v17, %v3145_v58 }
 0x22f   : > { %v1593_v1 = vadd.f32 %v3216_v45, %v1566_v3 }
 0x230   : > { %v1564_v4 = vadd.f32 %v1521_v16, %v1112_v23  ;;  %v1592_v47 = vadd.f32 %v3216_v45, %v1565_v37 }
 0x231   : > { %v1089_v51 = vpop.f32.mrf.mxu2  ;;  %v3197_v6 = vpop.f32.mrf.mxu0  ;;  %vm1617_vm3 = vcmp.ge.f32.partialorder %v1593_v1, 0.0 }
 0x232   : > { %v1528_v60 = vpop.f32.mrf.mxu3  ;;  %v1090_v40 = vadd.f32 %v1089_v51, %v1021_v10  ;;  %v1461_v38 = vpop.f32.mrf.mxu1  ;;  %v1640_v17 = vmul.f32 0.1, %v1592_v47  ;;  %vm1616_vm4 = vcmp.ge.f32.partialorder %v1592_v47, 0.0 }
 0x233   : > { %v1529_v39 = vadd.f32 %v1528_v60, %v1459_v33 }
 0x234   : > { %v3200_v48 = vadd.f32 %v3126_v54, %v1090_v40  ;;  %v1122_v54 = vadd.f32 %v2994_v8, %v3137_v61  ;;  %v1110_v61 = vadd.f32 %v2932_v19, %v1041_v62  ;;  %v1591_v19 = vadd.f32 %v3216_v45, %v1564_v4 }
 0x235   : > { %v1567_v43 = vadd.f32 %v1529_v39, %v1120_v24  ;;  %v1664_v52 = vsel %vm1616_vm4, %v1592_v47, %v1640_v17 }
 0x236   : > { %v1563_v28 = vadd.f32 %v1519_v55, %v1110_v61  ;;  %v1639_v0 = vmul.f32 0.1, %v1591_v19  ;;  %vm1615_vm5 = vcmp.ge.f32.partialorder %v1591_v19, 0.0 }
 0x237   : > { %v1594_v44 = vadd.f32 %v3216_v45, %v1567_v43 }
 0x238   : > { %v1590_v39 = vadd.f32 %v3216_v45, %v1563_v28 }
 0x239   : > { %v3213_v33 = vpop.f32.mrf.mxu2  ;;  %v3218_v49 = vpop.f32.mrf.mxu0  ;;  %v1642_v34 = vmul.f32 0.1, %v1594_v44  ;;  %vm1618_vm2 = vcmp.ge.f32.partialorder %v1594_v44, 0.0 }
 0x23a   : > { %v1530_v57 = vpop.f32.mrf.mxu3  ;;  %v1464_v20 = vpop.f32.mrf.mxu1  ;;  %v1638_v56 = vmul.f32 0.1, %v1590_v39  ;;  %vm1614_vm6 = vcmp.ge.f32.partialorder %v1590_v39, 0.0 }
 0x23b   : > { %v1531_v15 = vadd.f32 %v1530_v57, %v1461_v38  ;;  %v1641_v38 = vmul.f32 0.1, %v1593_v1  ;;  %v1666_v31 = vsel %vm1618_vm2, %v1594_v44, %v1642_v34  ;;  %v1663_v57 = vsel %vm1615_vm5, %v1591_v19, %v1639_v0 }
 0x23c   : > { %v1662_v16 = vsel %vm1614_vm6, %v1590_v39, %v1638_v56 }
 0x23d   : > { %v1568_v8 = vadd.f32 %v1531_v15, %v1122_v54  ;;  %v1665_v58 = vsel %vm1617_vm3, %v1593_v1, %v1641_v38  ;;  %v3397_v38 = vld [vmem:[#allocation11_spill] sm:$0xff] }
 0x23f   : > { %v1595_v53 = vadd.f32 %v3216_v45, %v1568_v8 }
 0x241   : > { %vm1619_vm1 = vcmp.ge.f32.partialorder %v1595_v53, 0.0  ;;  %v1643_v36 = vmul.f32 0.1, %v1595_v53  ;;  %v3229_v35 = vpop.f32.mrf.mxu2  ;;  %v742_v51 = vpop.f32.mrf.mxu0 }
 0x242   : > { %v1533_v18 = vpop.f32.mrf.mxu3  ;;  %v3232_v60 = vpop.f32.mrf.mxu1  ;;  %v743_v34 = vadd.f32 %v742_v51, %v3005_v21  ;;  %v3398_v51 = vld [vmem:[#allocation16_spill] sm:$0xff] }
 0x243   : > { %v1534_v10 = vadd.f32 %v1533_v18, %v1464_v20  ;;  %v1667_v40 = vsel %vm1619_vm1, %v1595_v53, %v1643_v36 }
 0x244   : > { %1679 = vmatpush.msra.mxu0 %v1667_v40 }
 0x245   : > { %v3235_v24 = vadd.f32 %v1534_v10, %v1125_v29 }
 0x246   : > { %1680 = vmatpush.msra.mxu0 %v1666_v31  ;;  %v3399_v31 = vld [vmem:[#allocation10_spill] sm:$0xff] }
 0x248   : > { %1681 = vmatpush.msra.mxu0 %v1665_v58 }
 0x249   : > { %v1096_v43 = vpop.f32.mrf.mxu2  ;;  %v745_v63 = vpop.f32.mrf.mxu0 }
 0x24a   : > { %v3237_v62 = vpop.f32.mrf.mxu3  ;;  %1682 = vmatpush.msra.mxu0 %v1664_v52  ;;  %v3239_v54 = vpop.f32.mrf.mxu1  ;;  %v746_v28 = vadd.f32 %v745_v63, %v3021_v42  ;;  %v738_v42 = vadd.f32 %v3197_v6, %v2980_v59 }
 0x24c   : > { %1683 = vmatpush.msra.mxu0 %v1663_v57 }
 0x24e   : > { %1684 = vmatpush.msra.mxu0 %v1662_v16 }
 0x251   : > { %v1099_v3 = vpop.f32.mrf.mxu2  ;;  %v747_v20 = vpop.f32.mrf.mxu0 }
 0x252   : > { %v3241_v15 = vpop.f32.mrf.mxu3  ;;  %v3243_v55 = vpop.f32.mrf.mxu1  ;;  %v748_v4 = vadd.f32 %v747_v20, %v3030_v50  ;;  %v1031_v50 = vadd.f32 %v3026_v46, %v746_v28  ;;  %v3400_v46 = vld [vmem:[#allocation9_spill] sm:$0xff]  ;;  %v3401_v28 = vld [vmem:[#allocation22_spill] sm:$0xff] }
 0x253   : > { %v1023_v52 = vadd.f32 %v3400_v46, %v738_v42 }
 0x254   : > { %v1033_v29 = vadd.f32 %v3042_v5, %v748_v4  ;;  %v1100_v39 = vadd.f32 %v1099_v3, %v1031_v50 }
 0x255   : > { %v1092_v63 = vadd.f32 %v3213_v33, %v1023_v52 }
 0x256   : > { %v1559_v59 = vadd.f32 %v3162_v22, %v1100_v39  ;;  %v3408_v39 = vld [vmem:[#allocation17_spill] sm:$0xff] }
 0x258   : > { %v1586_v20 = vadd.f32 %v3216_v45, %v1559_v59 }
 0x259   : > { %v1101_v23 = vpop.f32.mrf.mxu2  ;;  %v750_v44 = vpop.f32.mrf.mxu0 }
 0x25a   : > { %v3245_v37 = vpop.f32.mrf.mxu3  ;;  %v3247_v8 = vpop.f32.mrf.mxu1  ;;  %v751_v61 = vadd.f32 %v750_v44, %v3046_v14  ;;  %v741_v14 = vadd.f32 %v3218_v49, %v2996_v12  ;;  %v1102_v40 = vadd.f32 %v1101_v23, %v1033_v29  ;;  %v1556_v23 = vadd.f32 %v3139_v41, %v1092_v63  ;;  %v3404_v29 = vld [vmem:[#allocation15_spill] sm:$0xff] }
 0x25b   : > { %vm1610_vm10 = vcmp.ge.f32.partialorder %v1586_v20, 0.0 }
 0x25c   : > { %v1036_v47 = vadd.f32 %v3053_v25, %v751_v61  ;;  %v1028_v25 = vadd.f32 %v3397_v38, %v743_v34  ;;  %v1026_v17 = vadd.f32 %v3399_v31, %v741_v14  ;;  %v1560_v12 = vadd.f32 %v3167_v7, %v1102_v40  ;;  %v3403_v34 = vld [vmem:[#allocation23_spill] sm:$0xff]  ;;  %v3406_v14 = vld [vmem:[#allocation18_spill] sm:$0xff] }
 0x25d   : > { %v1583_v41 = vadd.f32 %v3216_v45, %v1556_v23 }
 0x25e   : > { %v1097_v0 = vadd.f32 %v1096_v43, %v1028_v25  ;;  %v1095_v56 = vadd.f32 %v3229_v35, %v1026_v17  ;;  %v1587_v16 = vadd.f32 %v3216_v45, %v1560_v12  ;;  %v3407_v25 = vld [vmem:[#allocation24_spill] sm:$0xff]  ;;  %v1582_v17 = vadd.f32 %v3216_v45, %v3200_v48 }
 0x25f   : > { %vm1607_vm14 = vcmp.ge.f32.partialorder %v1583_v41, 0.0  ;;  %v1631_v52 = vmul.f32 0.1, %v1583_v41  ;;  %v1541_v48 = vadd.f32 %v3245_v37, %v3243_v55 }
 0x260   : > { %v1558_v57 = vadd.f32 %v3156_v13, %v1097_v0  ;;  %v1557_v7 = vadd.f32 %v3147_v2, %v1095_v56  ;;  %v1635_v13 = vmul.f32 0.1, %v1587_v16  ;;  %vm1611_vm9 = vcmp.ge.f32.partialorder %v1587_v16, 0.0 }
 0x261   : > { %v1104_v1 = vpop.f32.mrf.mxu2  ;;  %v752_v36 = vpop.f32.mrf.mxu0  ;;  %vm1606_vm15 = vcmp.ge.f32.partialorder %v1582_v17, 0.0  ;;  %v1655_v37 = vsel %vm1607_vm14, %v1583_v41, %v1631_v52  ;;  %v1722_v52 = vld [vmem:[%s3368_s4 + $0x10] sm:$0xff] (%p321_p1) }
 0x262   : > { %v3251_v53 = vpop.f32.mrf.mxu3  ;;  %v1105_v18 = vadd.f32 %v1104_v1, %v1036_v47  ;;  %v753_v19 = vadd.f32 %v752_v36, %v3057_v27  ;;  %v1476_v10 = vpop.f32.mrf.mxu1  ;;  %v1584_v61 = vadd.f32 %v3216_v45, %v1557_v7  ;;  %v1634_v1 = vmul.f32 0.1, %v1586_v20  ;;  %v3402_v47 = vld [vmem:[#allocation14_spill] sm:$0xff]  ;;  %v3412_v7 = vld [vmem:[#allocation13_spill] sm:$0xff] }
 0x263   : > { %v1132_v36 = vadd.f32 %v3402_v47, %v3401_v28  ;;  %v1659_v42 = vsel %vm1611_vm9, %v1587_v16, %v1635_v13 }
 0x264   : > { %v1561_v21 = vadd.f32 %v3172_v30, %v1105_v18  ;;  %v1038_v5 = vadd.f32 %v3398_v51, %v753_v19  ;;  %v1135_v18 = vadd.f32 %v3404_v29, %v3403_v34  ;;  %v3405_v19 = vld [vmem:[#allocation25_spill] sm:$0xff]  ;;  %v3409_v51 = vld [vmem:[#allocation26_spill] sm:$0xff]  ;;  %v1658_v12 = vsel %vm1610_vm10, %v1586_v20, %v1634_v1 }
 0x265   : > { %v1140_v50 = vadd.f32 %v3406_v14, %v3405_v19  ;;  %vm1608_vm12 = vcmp.ge.f32.partialorder %v1584_v61, 0.0  ;;  %v2568_v14 = vmov 1.0  }
 0x266   : > { %v1588_v6 = vadd.f32 %v3216_v45, %v1561_v21  ;;  %v1137_v21 = vadd.f32 %v3408_v39, %v3407_v25 }
 0x268   : > { %v1636_v22 = vmul.f32 0.1, %v1588_v6  ;;  %vm1612_vm8 = vcmp.ge.f32.partialorder %v1588_v6, 0.0 }
 0x269   : > { %v1106_v27 = vpop.f32.mrf.mxu2 }
 0x26a   : > { %v1545_v58 = vpop.f32.mrf.mxu3  ;;  %v1107_v49 = vadd.f32 %v1106_v27, %v1038_v5  ;;  %v1479_v3 = vpop.f32.mrf.mxu1  ;;  %v1660_v2 = vsel %vm1612_vm8, %v1588_v6, %v1636_v22  ;;  %v3410_v5 = vld [vmem:[#allocation19_spill] sm:$0xff]  ;;  %v1544_v27 = vadd.f32 %v3251_v53, %v3247_v8  ;;  %v1580_v8 = vadd.f32 %v3216_v45, %v3188_v26  ;;  %v3414_v22 = vld [vmem:[#allocation12_spill] sm:$0xff] }
 0x26b   : > { %v1546_v40 = vadd.f32 %v1545_v58, %v1476_v10  ;;  %v1142_v31 = vadd.f32 %v3410_v5, %v3409_v51  ;;  %v1581_v10 = vadd.f32 %v3216_v45, %v3193_v32  ;;  %v1539_v53 = vadd.f32 %v3241_v15, %v3239_v54 }
 0x26c   : > { %v1562_v30 = vadd.f32 %v3177_v9, %v1107_v49  ;;  %v1585_v9 = vadd.f32 %v3216_v45, %v1558_v57  ;;  %v1632_v49 = vmul.f32 0.1, %v1584_v61  ;;  %v1630_v32 = vmul.f32 0.1, %v1582_v17 }
 0x26d   : > { %v1574_v56 = vadd.f32 %v1546_v40, %v1137_v21  ;;  %vm1605_vm1 = vcmp.ge.f32.partialorder %v1581_v10, 0.0  ;;  %v1536_v26 = vadd.f32 %v3237_v62, %v3232_v60  ;;  %v1572_v54 = vadd.f32 %v1541_v48, %v1132_v36  ;;  %v1721_v48 = vld [vmem:[%s3368_s4 + $0x8] sm:$0xff] (%p321_p1) }
 0x26e   : > { %v1589_v43 = vadd.f32 %v3216_v45, %v1562_v30  ;;  %v1633_v38 = vmul.f32 0.1, %v1585_v9  ;;  %vm1609_vm11 = vcmp.ge.f32.partialorder %v1585_v9, 0.0  ;;  %v1573_v30 = vadd.f32 %v1544_v27, %v1135_v18 }
 0x26f   : > { %v1656_v16 = vsel %vm1608_vm12, %v1584_v61, %v1632_v49  ;;  %v1601_v15 = vadd.f32 %v3216_v45, %v1574_v56  ;;  %vm1604_vm3 = vcmp.ge.f32.partialorder %v1580_v8, 0.0  ;;  %v1596_v40 = vadd.f32 %v3216_v45, %v3235_v24  ;;  %v1727_v49 = vld [vmem:[%s3368_s4 + $0x38] sm:$0xff] (%p321_p1)  ;;  %v1720_v56 = vld [vmem:[%s3368_s4] sm:$0xff] (%p321_p1) }
 0x270   : > { %vm1613_vm7 = vcmp.ge.f32.partialorder %v1589_v43, 0.0  ;;  %v1637_v35 = vmul.f32 0.1, %v1589_v43  ;;  %v1657_v6 = vsel %vm1609_vm11, %v1585_v9, %v1633_v38  ;;  %v1654_v9 = vsel %vm1606_vm15, %v1582_v17, %v1630_v32  ;;  %v3416_v17 = vld [vmem:[#allocation7_spill] sm:$0xff] }
 0x271   : > { %v1600_v13 = vadd.f32 %v3216_v45, %v1573_v30  ;;  %v1649_v28 = vmul.f32 0.1, %v1601_v15  ;;  %vm1625_vm5 = vcmp.ge.f32.partialorder %v1601_v15, 0.0  ;;  %v1644_v51 = vmul.f32 0.1, %v1596_v40 }
 0x272   : > { %v1548_v44 = vpop.f32.mrf.mxu3  ;;  %v1661_v33 = vsel %vm1613_vm7, %v1589_v43, %v1637_v35  ;;  %v1481_v58 = vpop.f32.mrf.mxu1  ;;  %v3411_v43 = vld [vmem:[#allocation21_spill] sm:$0xff]  ;;  %v3413_v35 = vld [vmem:[#allocation20_spill] sm:$0xff]  ;;  %vm1620_vm10 = vcmp.ge.f32.partialorder %v1596_v40, 0.0 }
 0x273   : > { %1685 = vmatpush.msra.mxu0 %v1661_v33  ;;  %v1549_v4 = vadd.f32 %v1548_v44, %v1479_v3  ;;  %v1130_v55 = vadd.f32 %v3412_v7, %v3411_v43  ;;  %v1629_v3 = vmul.f32 0.1, %v1581_v10  ;;  %v1127_v23 = vadd.f32 %v3414_v22, %v3413_v35 }
 0x274   : > { %v1628_v33 = vmul.f32 0.1, %v1580_v8  ;;  %v1648_v29 = vmul.f32 0.1, %v1600_v13  ;;  %vm1624_vm6 = vcmp.ge.f32.partialorder %v1600_v13, 0.0  ;;  %v1673_v41 = vsel %vm1625_vm5, %v1601_v15, %v1649_v28 }
 0x275   : > { %1686 = vmatpush.msra.mxu0 %v1660_v2  ;;  %v1575_v0 = vadd.f32 %v1549_v4, %v1140_v50  ;;  %v1571_v44 = vadd.f32 %v1539_v53, %v1130_v55  ;;  %v1653_v60 = vsel %vm1605_vm1, %v1581_v10, %v1629_v3  ;;  %v1570_v62 = vadd.f32 %v1536_v26, %v1127_v23  ;;  %v1726_v10 = vld [vmem:[%s3368_s4 + $0x30] sm:$0xff] (%p321_p1) }
 0x276   : > { %v1599_v2 = vadd.f32 %v3216_v45, %v1572_v54  ;;  %v1652_v36 = vsel %vm1604_vm3, %v1580_v8, %v1628_v33 }
 0x277   : > { %1687 = vmatpush.msra.mxu0 %v1659_v42  ;;  %v1602_v63 = vadd.f32 %v3216_v45, %v1575_v0  ;;  %v1598_v47 = vadd.f32 %v3216_v45, %v1571_v44  ;;  %v1597_v18 = vadd.f32 %v3216_v45, %v1570_v62  ;;  %v1672_v42 = vsel %vm1624_vm6, %v1600_v13, %v1648_v29  ;;  %v3417_v0 = vld [vmem:[#allocation8_spill] sm:$0xff] }
 0x278   : > { %v1647_v19 = vmul.f32 0.1, %v1599_v2  ;;  %vm1623_vm7 = vcmp.ge.f32.partialorder %v1599_v2, 0.0 }
 0x279   : > { %1688 = vmatpush.msra.mxu0 %v1658_v12  ;;  %v1650_v4 = vmul.f32 0.1, %v1602_v63  ;;  %vm1626_vm4 = vcmp.ge.f32.partialorder %v1602_v63, 0.0  ;;  %v1646_v38 = vmul.f32 0.1, %v1598_v47  ;;  %vm1622_vm8 = vcmp.ge.f32.partialorder %v1598_v47, 0.0 }
 0x27a   : > { %v1550_v46 = vpop.f32.mrf.mxu3  ;;  %v1671_v25 = vsel %vm1623_vm7, %v1599_v2, %v1647_v19  ;;  %v1645_v39 = vmul.f32 0.1, %v1597_v18  ;;  %vm1621_vm9 = vcmp.ge.f32.partialorder %v1597_v18, 0.0 }
 0x27b   : > { %v1551_v59 = vadd.f32 %v1550_v46, %v1481_v58  ;;  %1689 = vmatpush.msra.mxu0 %v1657_v6  ;;  %v1674_v34 = vsel %vm1626_vm4, %v1602_v63, %v1650_v4  ;;  %v1670_v21 = vsel %vm1622_vm8, %v1598_v47, %v1646_v38  ;;  %v1725_v58 = vld [vmem:[%s3368_s4 + $0x28] sm:$0xff] (%p321_p1)  ;;  %v1724_v46 = vld [vmem:[%s3368_s4 + $0x20] sm:$0xff] (%p321_p1) }
 0x27c   : > { %v1669_v5 = vsel %vm1621_vm9, %v1597_v18, %v1645_v39 }
 0x27d   : > { %v1576_v57 = vadd.f32 %v1551_v59, %v1142_v31  ;;  %1690 = vmatpush.msra.mxu0 %v1656_v16  ;;  %v1668_v31 = vsel %vm1620_vm10, %v1596_v40, %v1644_v51  ;;  %v1728_v59 = vld [vmem:[%s3369_s5] sm:$0x1] (%p321_p1) }
 0x27f   : > { %v1603_v20 = vadd.f32 %v3216_v45, %v1576_v57  ;;  %1691 = vmatpush.msra.mxu0 %v1655_v37 }
 0x281   : > { %vm1627_vm2 = vcmp.ge.f32.partialorder %v1603_v20, 0.0  ;;  %v1651_v61 = vmul.f32 0.1, %v1603_v20  ;;  %1692 = vmatpush.msra.mxu0 %v1654_v9 }
 0x283   : > { %v1675_v1 = vsel %vm1627_vm2, %v1603_v20, %v1651_v61  ;;  %1693 = vmatpush.msra.mxu0 %v1653_v60 }
 0x284   : > { %1707 = vmatpush.msra.mxu2 %v1675_v1 }
 0x285   : > { %1694 = vmatpush.msra.mxu0 %v1652_v36 }
 0x286   : > { %1708 = vmatpush.msra.mxu2 %v1674_v34  ;;  %2357 = vmatmul.msk.f32.vlgmr.msra.gmra.mxu0 %vm2686_vm13, %v2568_v14  ;;  %vm1753_vm13 = vcmask (%p321_p1), 8192  }
 0x287   :  { %1741 = vmatpush.msra.mxu0 (%p321_p1), %v1727_v49 }
 0x288   : > { %1709 = vmatpush.msra.mxu2 %v1673_v41 }
 0x289   :  { %1742 = vmatpush.msra.mxu0 (%p321_p1), %v1726_v10 }
 0x28a   : > { %1710 = vmatpush.msra.mxu2 %v1672_v42 }
 0x28b   :  { %1743 = vmatpush.msra.mxu0 (%p321_p1), %v1725_v58 }
 0x28c   : > { %1711 = vmatpush.msra.mxu2 %v1671_v25 }
 0x28d   :  { %1744 = vmatpush.msra.mxu0 (%p321_p1), %v1724_v46 }
 0x28e   : > { %1712 = vmatpush.msra.mxu2 %v1670_v21 }
 0x28f   :  { %1745 = vmatpush.msra.mxu0 (%p321_p1), %v1723_v11 }
 0x290   : > { %1713 = vmatpush.msra.mxu2 %v1669_v5 }
 0x291   :  { %1746 = vmatpush.msra.mxu0 (%p321_p1), %v1722_v52 }
 0x292   : > { %1714 = vmatpush.msra.mxu2 %v1668_v31 }
 0x293   : > { %2358 = vmatmul.msk.f32.vlgmr.msra.gmra.mxu2 %vm615_vm0, %v3416_v17  ;;  %1747 = vmatpush.msra.mxu0 (%p321_p1), %v1721_v48 }
 0x295   :  { %1748 = vmatpush.msra.mxu0 (%p321_p1), %v1720_v56 }
 0x303   : > { %v1696_v45 = vpop.f32.mrf.mxu0 }
 0x316   : > { %v1716_v24 = vpop.f32.mrf.mxu2 }
 0x317   : > { %v1717_v27 = vadd.f32 %v1716_v24, %v1696_v45  ;;  %323 = sbr.rel (!%p321_p1) target bundleno = 188 (0xbc), region = 76 }
 0x319   : > { %v1719_v12 = vadd.f32 %v3417_v0, %v1717_v27  }
 0x31b   : > { %v3418_v62 = vmov %v1719_v12  ;;  %2359 = vmatmul.msk.f32.vlgmr.msra.gmra.mxu0 (%p321_p1), %vm615_vm0, %v1719_v12 }
 0x398   :  { %v1750_v6 = vpop.f32.mrf.mxu0 }
 0x399   :  { %v1751_v8 = vadd.f32 %v1750_v6, %v1728_v59 }
 0x39b   :  { %1754 = vst.msk [vmem:[#allocation3] sm:$0x1] %vm1753_vm13, %v1751_v8 }
 0x39c   :  { %1765 = dma.vmem_to_hbm [thread:$0]  %s1761_s3, 16, %s1763_s12, [#allocation4]  }
 0x39d   :  { %2552 = dma.done.wait [#allocation4], 16  }
 0x39e   :  { %2553 = vsyncadd [#allocation4], 4294967280 }
 0x39f   :  { %1770 = vsyncpa [#allocation4], 1 }

</bundles_post_ra>
